<compile_context>
chip_gen: v6e
topology: v6e:2x2x1
jax: 0.10.0
libtpu: 0.0.40
codegen_flags: <defaults>
</compile_context>

<pallas_src>
import jax
import jax.numpy as jnp
from jax import lax
from jax.experimental import pallas as pl
from jax.experimental.pallas import tpu as pltpu

# ---------------- small shapes consistent with the module ----------------
B = 2            # batch
T = 8            # sequence length
VOCAB = 50       # embedding rows
EMBED = 32       # opt.embed_dim
HID = 32         # opt.hidden_dim
TOPIC = 16       # opt.topic_dim
POL = 3          # opt.polarities_dim
BOW = 64         # bow_dim
ENC1, ENC2 = 1024, 512   # VAE encode_dims = [BOW, 1024, 512, TOPIC]
OUT_PAD = 128    # lane-dense padded head output (sliced back to POL outside)


# ---------------------------------------------------------------------------
# Fused kernel: masked LSTM recurrence + VAE encoder + classification head.
# Single program (no grid); everything small lives in VMEM; the two large
# encoder weights stream in via async DMA overlapped with the recurrence.
# ---------------------------------------------------------------------------
def lstm_vae_kernel(x_ref, lens_ref, bow_ref,
                    wx_ref, wh_ref, b_ref,
                    we0_hbm, be0_ref, we1_hbm, be1_ref,
                    wml_ref, bml_ref,
                    wdn1_ref, bdn1_ref, wdn2_ref, bdn2_ref,
                    e_ref,
                    out_ref,
                    xp_scr, we0_vmem, we1_vmem, dma_sem):
    f32 = jnp.float32
    bf16 = jnp.bfloat16

    Bn = lens_ref.shape[0]
    Hn = wh_ref.shape[0]
    Tn = x_ref.shape[0] // Bn
    Kt = e_ref.shape[1]

    # Kick off the big encoder-weight DMAs so they overlap the LSTM recurrence.
    cp0 = pltpu.make_async_copy(we0_hbm, we0_vmem, dma_sem.at[0])
    cp1 = pltpu.make_async_copy(we1_hbm, we1_vmem, dma_sem.at[1])
    cp0.start()
    cp1.start()

    # --- hoisted input projection for all timesteps: (T*B, E) @ (E, 4H) ---
    xp_scr[...] = (jnp.dot(x_ref[...], wx_ref[...], preferred_element_type=f32)
                   + b_ref[...])

    wh = wh_ref[...]            # (H, 4H), resident for the whole loop
    lens = lens_ref[...]        # (B, 1) int32

    def step(t, carry):
        h, c = carry
        row = pl.multiple_of(t * Bn, Bn)
        gates = (xp_scr[pl.ds(row, Bn), :]
                 + jnp.dot(h, wh, preferred_element_type=f32))   # (B, 4H) i,f,g,o
        i = jax.nn.sigmoid(gates[:, 0 * Hn:1 * Hn])
        f = jax.nn.sigmoid(gates[:, 1 * Hn:2 * Hn])
        g = jnp.tanh(gates[:, 2 * Hn:3 * Hn])
        o = jax.nn.sigmoid(gates[:, 3 * Hn:4 * Hn])
        c_new = f * c + i * g
        h_new = o * jnp.tanh(c_new)
        mask = t < lens                                          # (B, 1)
        return jnp.where(mask, h_new, h), jnp.where(mask, c_new, c)

    h0 = jnp.zeros((Bn, Hn), f32)
    c0 = jnp.zeros((Bn, Hn), f32)
    h_fwd, _ = lax.fori_loop(0, Tn, step, (h0, c0), unroll=True)

    # --- VAE encoder (bf16 weights, f32 accumulation) ---
    cp0.wait()
    h1 = jnp.maximum(
        jnp.dot(bow_ref[...].astype(bf16), we0_vmem[...],
                preferred_element_type=f32) + be0_ref[...], 0.0)
    cp1.wait()
    h2 = jnp.maximum(
        jnp.dot(h1.astype(bf16), we1_vmem[...],
                preferred_element_type=f32) + be1_ref[...], 0.0)

    # mu | log_var from one fused matmul, split with a static lane slice.
    ml = jnp.dot(h2, wml_ref[...], preferred_element_type=f32) + bml_ref[...]
    mu = ml[:, :Kt]
    lv = ml[:, Kt:]
    theta = mu + e_ref[...] * lv

    # --- classification head (output padded to OUT_PAD lanes) ---
    o1 = jnp.dot(h_fwd, wdn1_ref[...], preferred_element_type=f32) + bdn1_ref[...]
    out_ref[...] = (jnp.dot(o1 + theta, wdn2_ref[...], preferred_element_type=f32)
                    + bdn2_ref[...])


def _run_fused(x_flat, lens, bow, kp):
    vmem = pl.BlockSpec(memory_space=pltpu.MemorySpace.VMEM)
    hbm = pl.BlockSpec(memory_space=pl.ANY)
    in_specs = [
        vmem, vmem, vmem,            # x_flat, lens, bow
        vmem, vmem, vmem,            # wx, wh, b
        hbm, vmem, hbm, vmem,        # we0 (bf16, HBM), be0, we1 (bf16, HBM), be1
        vmem, vmem,                  # wml, bml
        vmem, vmem, vmem, vmem,      # wdn1, bdn1, wdn2 (padded), bdn2 (padded)
        vmem,                        # e
    ]
    scratch_shapes = [
        pltpu.VMEM((T * B, 4 * HID), jnp.float32),     # hoisted X@Wx
        pltpu.VMEM((BOW, ENC1), jnp.bfloat16),         # we0 landing buffer
        pltpu.VMEM((ENC1, ENC2), jnp.bfloat16),        # we1 landing buffer
        pltpu.SemaphoreType.DMA((2,)),
    ]
    return pl.pallas_call(
        lstm_vae_kernel,
        out_shape=jax.ShapeDtypeStruct((B, OUT_PAD), jnp.float32),
        in_specs=in_specs,
        out_specs=vmem,
        scratch_shapes=scratch_shapes,
    )(x_flat, lens, bow,
      kp["wx"], kp["wh"], kp["b"],
      kp["we0"], kp["be0"], kp["we1"], kp["be1"],
      kp["wml"], kp["bml"],
      kp["wdn1"], kp["bdn1"], kp["wdn2p"], kp["bdn2p"],
      kp["e"])


# ---------------------------------------------------------------------------
# Full forward (glue in plain JAX: embedding gather + length computation,
# both fused under one jit so dispatch overhead is minimal).
# ---------------------------------------------------------------------------
@jax.jit
def lstm_vae_forward(text_raw_indices, bow, kp):
    # gather directly in time-major flattened order: row t*B + b = emb[idx[b, t]]
    idx_tm = jnp.transpose(text_raw_indices, (1, 0)).reshape(-1)      # (T*B,)
    x_flat = jnp.take(kp["emb"], idx_tm, axis=0)                       # (T*B, E)
    x_len = jnp.sum(text_raw_indices != 0, axis=-1).astype(jnp.int32)
    out_pad = _run_fused(x_flat, x_len.reshape(-1, 1), bow, kp)
    return out_pad[:, :POL]


def prep_kernel_params(p):
    """Derive the kernel-side parameter layout from the plain f32 params."""
    kp = dict(p)
    kp["we0"] = p["we0"].astype(jnp.bfloat16)
    kp["we1"] = p["we1"].astype(jnp.bfloat16)
    kp["wml"] = jnp.concatenate([p["wmu"], p["wlv"]], axis=1)          # (ENC2, 2*TOPIC)
    kp["bml"] = jnp.concatenate([p["bmu"], p["blv"]], axis=1)          # (1, 2*TOPIC)
    kp["wdn2p"] = jnp.zeros((TOPIC, OUT_PAD), jnp.float32).at[:, :POL].set(p["wdn2"])
    kp["bdn2p"] = jnp.zeros((1, OUT_PAD), jnp.float32).at[:, :POL].set(p["bdn2"])
    return kp


# ---------------------------------------------------------------------------
# Pure-JAX reference (same math, f32 weights) for a sanity check.
# ---------------------------------------------------------------------------
def reference(text_raw_indices, bow, p):
    x = jnp.take(p["emb"], text_raw_indices, axis=0)
    x_len = jnp.sum(text_raw_indices != 0, axis=-1)
    h = jnp.zeros((B, HID), jnp.float32)
    c = jnp.zeros((B, HID), jnp.float32)
    for t in range(T):
        xt = x[:, t, :]
        gates = xt @ p["wx"] + h @ p["wh"] + p["b"]
        i = jax.nn.sigmoid(gates[:, :HID])
        f = jax.nn.sigmoid(gates[:, HID:2 * HID])
        g = jnp.tanh(gates[:, 2 * HID:3 * HID])
        o = jax.nn.sigmoid(gates[:, 3 * HID:])
        cn = f * c + i * g
        hn = o * jnp.tanh(cn)
        m = (t < x_len)[:, None]
        h = jnp.where(m, hn, h)
        c = jnp.where(m, cn, c)
    h1 = jax.nn.relu(bow @ p["we0"] + p["be0"])
    h2 = jax.nn.relu(h1 @ p["we1"] + p["be1"])
    mu = h2 @ p["wmu"] + p["bmu"]
    lv = h2 @ p["wlv"] + p["blv"]
    theta = mu + p["e"] * lv
    out = (h @ p["wdn1"] + p["bdn1"] + theta) @ p["wdn2"] + p["bdn2"]
    return out


if __name__ == "__main__":
    root = jax.random.PRNGKey(0)
    ks = list(jax.random.split(root, 40))

    def w(k, shape, s=0.05):
        return (s * jax.random.normal(k, shape)).astype(jnp.float32)

    p = {
        "emb":  w(ks[0], (VOCAB, EMBED), 0.5),
        # forward-direction LSTM weights (gate order i,f,g,o), pre-transposed
        "wx":   w(ks[1], (EMBED, 4 * HID)),
        "wh":   w(ks[2], (HID, 4 * HID)),
        "b":    w(ks[3], (1, 4 * HID)),
        # VAE encoder
        "we0":  w(ks[4], (BOW, ENC1)),    "be0": w(ks[5], (1, ENC1)),
        "we1":  w(ks[6], (ENC1, ENC2)),   "be1": w(ks[7], (1, ENC2)),
        "wmu":  w(ks[8], (ENC2, TOPIC)),  "bmu": w(ks[9], (1, TOPIC)),
        "wlv":  w(ks[10], (ENC2, TOPIC)), "blv": w(ks[11], (1, TOPIC)),
        # head
        "wdn1": w(ks[18], (HID, TOPIC)),  "bdn1": w(ks[19], (1, TOPIC)),
        "wdn2": w(ks[20], (TOPIC, POL)),  "bdn2": w(ks[21], (1, POL)),
        "e":    w(ks[22], (1, TOPIC), 1.0),
    }
    kp = prep_kernel_params(p)

    # inputs: padded token indices (0 = pad) and bag-of-words vector
    idx = jax.random.randint(ks[23], (B, T), 1, VOCAB, dtype=jnp.int32)
    pad = jnp.array([[1] * T, [1] * 5 + [0] * 3], dtype=jnp.int32)   # lengths 8, 5
    idx = idx * pad
    bow = jnp.abs(jax.random.normal(ks[24], (B, BOW))).astype(jnp.float32)

    out = lstm_vae_forward(idx, bow, kp)
    out = jax.block_until_ready(out)

    ref_out = reference(idx, bow, p)
    assert out.shape == (B, POL)
    assert jnp.allclose(out, ref_out, rtol=5e-2, atol=5e-2)
    print("KERNEL_OK")
</pallas_src>

<mosaic_0001>
module attributes {stable_mosaic.version = 11 : i64} {
  func.func @lstm_vae_kernel(%arg0: memref<16x32xf32, #tpu.memory_space<vmem>>, %arg1: memref<2x1xi32, #tpu.memory_space<vmem>>, %arg2: memref<2x64xf32, #tpu.memory_space<vmem>>, %arg3: memref<32x128xf32, #tpu.memory_space<vmem>>, %arg4: memref<32x128xf32, #tpu.memory_space<vmem>>, %arg5: memref<1x128xf32, #tpu.memory_space<vmem>>, %arg6: memref<64x1024xbf16, #tpu.memory_space<any>>, %arg7: memref<1x1024xf32, #tpu.memory_space<vmem>>, %arg8: memref<1024x512xbf16, #tpu.memory_space<any>>, %arg9: memref<1x512xf32, #tpu.memory_space<vmem>>, %arg10: memref<512x32xf32, #tpu.memory_space<vmem>>, %arg11: memref<1x32xf32, #tpu.memory_space<vmem>>, %arg12: memref<32x16xf32, #tpu.memory_space<vmem>>, %arg13: memref<1x16xf32, #tpu.memory_space<vmem>>, %arg14: memref<16x128xf32, #tpu.memory_space<vmem>>, %arg15: memref<1x128xf32, #tpu.memory_space<vmem>>, %arg16: memref<1x16xf32, #tpu.memory_space<vmem>>, %arg17: memref<2x128xf32, #tpu.memory_space<vmem>>, %arg18: memref<16x128xf32, #tpu.memory_space<vmem>>, %arg19: memref<64x1024xbf16, #tpu.memory_space<vmem>>, %arg20: memref<1024x512xbf16, #tpu.memory_space<vmem>>, %arg21: memref<2x!tpu.dma_semaphore, #tpu.memory_space<semaphore_mem>>) attributes {dimension_semantics = [], scalar_prefetch = 0 : i64, scratch_operands = 4 : i64, tpu.core_type = #tpu.core_type<tc>} {
    %c0_i32 = arith.constant 0 : i32
    %0 = tpu.memref_slice %arg21[%c0_i32] : memref<2x!tpu.dma_semaphore, #tpu.memory_space<semaphore_mem>> -> memref<1x!tpu.dma_semaphore, #tpu.memory_space<semaphore_mem>>
    %1 = tpu.memref_squeeze %0 : memref<1x!tpu.dma_semaphore, #tpu.memory_space<semaphore_mem>> -> memref<!tpu.dma_semaphore, #tpu.memory_space<semaphore_mem>>
    tpu.enqueue_dma source(%arg6 : memref<64x1024xbf16, #tpu.memory_space<any>>) target(%arg19 : memref<64x1024xbf16, #tpu.memory_space<vmem>>) target_semaphore(%1 : memref<!tpu.dma_semaphore, #tpu.memory_space<semaphore_mem>>)
    %c1_i32 = arith.constant 1 : i32
    %2 = tpu.memref_slice %arg21[%c1_i32] : memref<2x!tpu.dma_semaphore, #tpu.memory_space<semaphore_mem>> -> memref<1x!tpu.dma_semaphore, #tpu.memory_space<semaphore_mem>>
    %3 = tpu.memref_squeeze %2 : memref<1x!tpu.dma_semaphore, #tpu.memory_space<semaphore_mem>> -> memref<!tpu.dma_semaphore, #tpu.memory_space<semaphore_mem>>
    tpu.enqueue_dma source(%arg8 : memref<1024x512xbf16, #tpu.memory_space<any>>) target(%arg20 : memref<1024x512xbf16, #tpu.memory_space<vmem>>) target_semaphore(%3 : memref<!tpu.dma_semaphore, #tpu.memory_space<semaphore_mem>>)
    %c0 = arith.constant 0 : index
    %c0_0 = arith.constant 0 : index
    %4 = vector.load %arg0[%c0, %c0_0] : memref<16x32xf32, #tpu.memory_space<vmem>>, vector<16x32xf32>
    %c0_1 = arith.constant 0 : index
    %c0_2 = arith.constant 0 : index
    %5 = vector.load %arg3[%c0_1, %c0_2] : memref<32x128xf32, #tpu.memory_space<vmem>>, vector<32x128xf32>
    %cst = arith.constant dense<0.000000e+00> : vector<16x128xf32>
    %6 = tpu.matmul %4, %5, %cst {dimension_numbers = #tpu.dot_dimension_numbers<[1], [0], [0], [1], [0, 0, 1, 1], [], []>} : vector<16x32xf32>, vector<32x128xf32>, vector<16x128xf32> -> vector<16x128xf32>
    %c0_3 = arith.constant 0 : index
    %c0_4 = arith.constant 0 : index
    %7 = vector.load %arg5[%c0_3, %c0_4] : memref<1x128xf32, #tpu.memory_space<vmem>>, vector<1x128xf32>
    %8 = vector.broadcast %7 : vector<1x128xf32> to vector<16x128xf32>
    %9 = arith.addf %6, %8 : vector<16x128xf32>
    %c0_5 = arith.constant 0 : index
    %c0_6 = arith.constant 0 : index
    %10 = vector.load %arg18[%c0_5, %c0_6] : memref<16x128xf32, #tpu.memory_space<vmem>>, vector<16x128xf32>
    tpu.vector_store %arg18[%c0_5, %c0_6], %9 {strides = array<i32>} : memref<16x128xf32, #tpu.memory_space<vmem>>, vector<16x128xf32>,
    %c0_7 = arith.constant 0 : index
    %c0_8 = arith.constant 0 : index
    %11 = vector.load %arg4[%c0_7, %c0_8] : memref<32x128xf32, #tpu.memory_space<vmem>>, vector<32x128xf32>
    %c0_9 = arith.constant 0 : index
    %c0_10 = arith.constant 0 : index
    %12 = vector.load %arg1[%c0_9, %c0_10] : memref<2x1xi32, #tpu.memory_space<vmem>>, vector<2x1xi32>
    %cst_11 = arith.constant 0.000000e+00 : f32
    %13 = vector.broadcast %cst_11 : f32 to vector<2x32xf32>
    %cst_12 = arith.constant 0.000000e+00 : f32
    %14 = vector.broadcast %cst_12 : f32 to vector<2x32xf32>
    %c0_i32_13 = arith.constant 0 : i32
    %c2_i32 = arith.constant 2 : i32
    %15 = arith.muli %c0_i32_13, %c2_i32 : i32
    %16 = tpu.assume_multiple %15, 2 : i32
    %17 = arith.index_cast %16 : i32 to index
    %c0_14 = arith.constant 0 : index
    %18 = vector.load %arg18[%17, %c0_14] : memref<16x128xf32, #tpu.memory_space<vmem>>, vector<2x128xf32>
    %cst_15 = arith.constant dense<0.000000e+00> : vector<2x128xf32>
    %19 = tpu.matmul %13, %11, %cst_15 {dimension_numbers = #tpu.dot_dimension_numbers<[1], [0], [0], [1], [0, 0, 1, 1], [], []>} : vector<2x32xf32>, vector<32x128xf32>, vector<2x128xf32> -> vector<2x128xf32>
    %20 = arith.addf %18, %19 : vector<2x128xf32>
    %21 = vector.extract_strided_slice %20 {offsets = [0, 0], sizes = [2, 32], strides = [1, 1]} : vector<2x128xf32> to vector<2x32xf32>
    %22 = arith.negf %21 : vector<2x32xf32>
    %23 = math.exp %22 : vector<2x32xf32>
    %cst_16 = arith.constant 1.000000e+00 : f32
    %24 = vector.broadcast %cst_16 : f32 to vector<2x32xf32>
    %25 = arith.addf %24, %23 : vector<2x32xf32>
    %26 = arith.divf %24, %25 : vector<2x32xf32>
    %27 = vector.extract_strided_slice %20 {offsets = [0, 32], sizes = [2, 32], strides = [1, 1]} : vector<2x128xf32> to vector<2x32xf32>
    %28 = arith.negf %27 : vector<2x32xf32>
    %29 = math.exp %28 : vector<2x32xf32>
    %cst_17 = arith.constant 1.000000e+00 : f32
    %30 = vector.broadcast %cst_17 : f32 to vector<2x32xf32>
    %31 = arith.addf %30, %29 : vector<2x32xf32>
    %32 = arith.divf %30, %31 : vector<2x32xf32>
    %33 = vector.extract_strided_slice %20 {offsets = [0, 64], sizes = [2, 32], strides = [1, 1]} : vector<2x128xf32> to vector<2x32xf32>
    %34 = math.tanh %33 : vector<2x32xf32>
    %35 = vector.extract_strided_slice %20 {offsets = [0, 96], sizes = [2, 32], strides = [1, 1]} : vector<2x128xf32> to vector<2x32xf32>
    %36 = arith.negf %35 : vector<2x32xf32>
    %37 = math.exp %36 : vector<2x32xf32>
    %cst_18 = arith.constant 1.000000e+00 : f32
    %38 = vector.broadcast %cst_18 : f32 to vector<2x32xf32>
    %39 = arith.addf %38, %37 : vector<2x32xf32>
    %40 = arith.divf %38, %39 : vector<2x32xf32>
    %41 = arith.mulf %32, %14 : vector<2x32xf32>
    %42 = arith.mulf %26, %34 : vector<2x32xf32>
    %43 = arith.addf %41, %42 : vector<2x32xf32>
    %44 = math.tanh %43 : vector<2x32xf32>
    %45 = arith.mulf %40, %44 : vector<2x32xf32>
    %46 = vector.broadcast %c0_i32_13 : i32 to vector<2x1xi32>
    %47 = arith.cmpi slt, %46, %12 : vector<2x1xi32>
    %48 = vector.shape_cast %47 : vector<2x1xi1> to vector<2x1xi1>
    %49 = vector.broadcast %48 : vector<2x1xi1> to vector<2x32xi1>
    %50 = arith.select %49, %45, %13 : vector<2x32xi1>, vector<2x32xf32>
    %51 = vector.shape_cast %47 : vector<2x1xi1> to vector<2x1xi1>
    %52 = vector.broadcast %51 : vector<2x1xi1> to vector<2x32xi1>
    %53 = arith.select %52, %43, %14 : vector<2x32xi1>, vector<2x32xf32>
    %c1_i32_19 = arith.constant 1 : i32
    %c2_i32_20 = arith.constant 2 : i32
    %54 = arith.muli %c1_i32_19, %c2_i32_20 : i32
    %55 = tpu.assume_multiple %54, 2 : i32
    %56 = arith.index_cast %55 : i32 to index
    %c0_21 = arith.constant 0 : index
    %57 = vector.load %arg18[%56, %c0_21] : memref<16x128xf32, #tpu.memory_space<vmem>>, vector<2x128xf32>
    %cst_22 = arith.constant dense<0.000000e+00> : vector<2x128xf32>
    %58 = tpu.matmul %50, %11, %cst_22 {dimension_numbers = #tpu.dot_dimension_numbers<[1], [0], [0], [1], [0, 0, 1, 1], [], []>} : vector<2x32xf32>, vector<32x128xf32>, vector<2x128xf32> -> vector<2x128xf32>
    %59 = arith.addf %57, %58 : vector<2x128xf32>
    %60 = vector.extract_strided_slice %59 {offsets = [0, 0], sizes = [2, 32], strides = [1, 1]} : vector<2x128xf32> to vector<2x32xf32>
    %61 = arith.negf %60 : vector<2x32xf32>
    %62 = math.exp %61 : vector<2x32xf32>
    %cst_23 = arith.constant 1.000000e+00 : f32
    %63 = vector.broadcast %cst_23 : f32 to vector<2x32xf32>
    %64 = arith.addf %63, %62 : vector<2x32xf32>
    %65 = arith.divf %63, %64 : vector<2x32xf32>
    %66 = vector.extract_strided_slice %59 {offsets = [0, 32], sizes = [2, 32], strides = [1, 1]} : vector<2x128xf32> to vector<2x32xf32>
    %67 = arith.negf %66 : vector<2x32xf32>
    %68 = math.exp %67 : vector<2x32xf32>
    %cst_24 = arith.constant 1.000000e+00 : f32
    %69 = vector.broadcast %cst_24 : f32 to vector<2x32xf32>
    %70 = arith.addf %69, %68 : vector<2x32xf32>
    %71 = arith.divf %69, %70 : vector<2x32xf32>
    %72 = vector.extract_strided_slice %59 {offsets = [0, 64], sizes = [2, 32], strides = [1, 1]} : vector<2x128xf32> to vector<2x32xf32>
    %73 = math.tanh %72 : vector<2x32xf32>
    %74 = vector.extract_strided_slice %59 {offsets = [0, 96], sizes = [2, 32], strides = [1, 1]} : vector<2x128xf32> to vector<2x32xf32>
    %75 = arith.negf %74 : vector<2x32xf32>
    %76 = math.exp %75 : vector<2x32xf32>
    %cst_25 = arith.constant 1.000000e+00 : f32
    %77 = vector.broadcast %cst_25 : f32 to vector<2x32xf32>
    %78 = arith.addf %77, %76 : vector<2x32xf32>
    %79 = arith.divf %77, %78 : vector<2x32xf32>
    %80 = arith.mulf %71, %53 : vector<2x32xf32>
    %81 = arith.mulf %65, %73 : vector<2x32xf32>
    %82 = arith.addf %80, %81 : vector<2x32xf32>
    %83 = math.tanh %82 : vector<2x32xf32>
    %84 = arith.mulf %79, %83 : vector<2x32xf32>
    %85 = vector.broadcast %c1_i32_19 : i32 to vector<2x1xi32>
    %86 = arith.cmpi slt, %85, %12 : vector<2x1xi32>
    %87 = vector.shape_cast %86 : vector<2x1xi1> to vector<2x1xi1>
    %88 = vector.broadcast %87 : vector<2x1xi1> to vector<2x32xi1>
    %89 = arith.select %88, %84, %50 : vector<2x32xi1>, vector<2x32xf32>
    %90 = vector.shape_cast %86 : vector<2x1xi1> to vector<2x1xi1>
    %91 = vector.broadcast %90 : vector<2x1xi1> to vector<2x32xi1>
    %92 = arith.select %91, %82, %53 : vector<2x32xi1>, vector<2x32xf32>
    %c2_i32_26 = arith.constant 2 : i32
    %c2_i32_27 = arith.constant 2 : i32
    %93 = arith.muli %c2_i32_26, %c2_i32_27 : i32
    %94 = tpu.assume_multiple %93, 2 : i32
    %95 = arith.index_cast %94 : i32 to index
    %c0_28 = arith.constant 0 : index
    %96 = vector.load %arg18[%95, %c0_28] : memref<16x128xf32, #tpu.memory_space<vmem>>, vector<2x128xf32>
    %cst_29 = arith.constant dense<0.000000e+00> : vector<2x128xf32>
    %97 = tpu.matmul %89, %11, %cst_29 {dimension_numbers = #tpu.dot_dimension_numbers<[1], [0], [0], [1], [0, 0, 1, 1], [], []>} : vector<2x32xf32>, vector<32x128xf32>, vector<2x128xf32> -> vector<2x128xf32>
    %98 = arith.addf %96, %97 : vector<2x128xf32>
    %99 = vector.extract_strided_slice %98 {offsets = [0, 0], sizes = [2, 32], strides = [1, 1]} : vector<2x128xf32> to vector<2x32xf32>
    %100 = arith.negf %99 : vector<2x32xf32>
    %101 = math.exp %100 : vector<2x32xf32>
    %cst_30 = arith.constant 1.000000e+00 : f32
    %102 = vector.broadcast %cst_30 : f32 to vector<2x32xf32>
    %103 = arith.addf %102, %101 : vector<2x32xf32>
    %104 = arith.divf %102, %103 : vector<2x32xf32>
    %105 = vector.extract_strided_slice %98 {offsets = [0, 32], sizes = [2, 32], strides = [1, 1]} : vector<2x128xf32> to vector<2x32xf32>
    %106 = arith.negf %105 : vector<2x32xf32>
    %107 = math.exp %106 : vector<2x32xf32>
    %cst_31 = arith.constant 1.000000e+00 : f32
    %108 = vector.broadcast %cst_31 : f32 to vector<2x32xf32>
    %109 = arith.addf %108, %107 : vector<2x32xf32>
    %110 = arith.divf %108, %109 : vector<2x32xf32>
    %111 = vector.extract_strided_slice %98 {offsets = [0, 64], sizes = [2, 32], strides = [1, 1]} : vector<2x128xf32> to vector<2x32xf32>
    %112 = math.tanh %111 : vector<2x32xf32>
    %113 = vector.extract_strided_slice %98 {offsets = [0, 96], sizes = [2, 32], strides = [1, 1]} : vector<2x128xf32> to vector<2x32xf32>
    %114 = arith.negf %113 : vector<2x32xf32>
    %115 = math.exp %114 : vector<2x32xf32>
    %cst_32 = arith.constant 1.000000e+00 : f32
    %116 = vector.broadcast %cst_32 : f32 to vector<2x32xf32>
    %117 = arith.addf %116, %115 : vector<2x32xf32>
    %118 = arith.divf %116, %117 : vector<2x32xf32>
    %119 = arith.mulf %110, %92 : vector<2x32xf32>
    %120 = arith.mulf %104, %112 : vector<2x32xf32>
    %121 = arith.addf %119, %120 : vector<2x32xf32>
    %122 = math.tanh %121 : vector<2x32xf32>
    %123 = arith.mulf %118, %122 : vector<2x32xf32>
    %124 = vector.broadcast %c2_i32_26 : i32 to vector<2x1xi32>
    %125 = arith.cmpi slt, %124, %12 : vector<2x1xi32>
    %126 = vector.shape_cast %125 : vector<2x1xi1> to vector<2x1xi1>
    %127 = vector.broadcast %126 : vector<2x1xi1> to vector<2x32xi1>
    %128 = arith.select %127, %123, %89 : vector<2x32xi1>, vector<2x32xf32>
    %129 = vector.shape_cast %125 : vector<2x1xi1> to vector<2x1xi1>
    %130 = vector.broadcast %129 : vector<2x1xi1> to vector<2x32xi1>
    %131 = arith.select %130, %121, %92 : vector<2x32xi1>, vector<2x32xf32>
    %c3_i32 = arith.constant 3 : i32
    %c2_i32_33 = arith.constant 2 : i32
    %132 = arith.muli %c3_i32, %c2_i32_33 : i32
    %133 = tpu.assume_multiple %132, 2 : i32
    %134 = arith.index_cast %133 : i32 to index
    %c0_34 = arith.constant 0 : index
    %135 = vector.load %arg18[%134, %c0_34] : memref<16x128xf32, #tpu.memory_space<vmem>>, vector<2x128xf32>
    %cst_35 = arith.constant dense<0.000000e+00> : vector<2x128xf32>
    %136 = tpu.matmul %128, %11, %cst_35 {dimension_numbers = #tpu.dot_dimension_numbers<[1], [0], [0], [1], [0, 0, 1, 1], [], []>} : vector<2x32xf32>, vector<32x128xf32>, vector<2x128xf32> -> vector<2x128xf32>
    %137 = arith.addf %135, %136 : vector<2x128xf32>
    %138 = vector.extract_strided_slice %137 {offsets = [0, 0], sizes = [2, 32], strides = [1, 1]} : vector<2x128xf32> to vector<2x32xf32>
    %139 = arith.negf %138 : vector<2x32xf32>
    %140 = math.exp %139 : vector<2x32xf32>
    %cst_36 = arith.constant 1.000000e+00 : f32
    %141 = vector.broadcast %cst_36 : f32 to vector<2x32xf32>
    %142 = arith.addf %141, %140 : vector<2x32xf32>
    %143 = arith.divf %141, %142 : vector<2x32xf32>
    %144 = vector.extract_strided_slice %137 {offsets = [0, 32], sizes = [2, 32], strides = [1, 1]} : vector<2x128xf32> to vector<2x32xf32>
    %145 = arith.negf %144 : vector<2x32xf32>
    %146 = math.exp %145 : vector<2x32xf32>
    %cst_37 = arith.constant 1.000000e+00 : f32
    %147 = vector.broadcast %cst_37 : f32 to vector<2x32xf32>
    %148 = arith.addf %147, %146 : vector<2x32xf32>
    %149 = arith.divf %147, %148 : vector<2x32xf32>
    %150 = vector.extract_strided_slice %137 {offsets = [0, 64], sizes = [2, 32], strides = [1, 1]} : vector<2x128xf32> to vector<2x32xf32>
    %151 = math.tanh %150 : vector<2x32xf32>
    %152 = vector.extract_strided_slice %137 {offsets = [0, 96], sizes = [2, 32], strides = [1, 1]} : vector<2x128xf32> to vector<2x32xf32>
    %153 = arith.negf %152 : vector<2x32xf32>
    %154 = math.exp %153 : vector<2x32xf32>
    %cst_38 = arith.constant 1.000000e+00 : f32
    %155 = vector.broadcast %cst_38 : f32 to vector<2x32xf32>
    %156 = arith.addf %155, %154 : vector<2x32xf32>
    %157 = arith.divf %155, %156 : vector<2x32xf32>
    %158 = arith.mulf %149, %131 : vector<2x32xf32>
    %159 = arith.mulf %143, %151 : vector<2x32xf32>
    %160 = arith.addf %158, %159 : vector<2x32xf32>
    %161 = math.tanh %160 : vector<2x32xf32>
    %162 = arith.mulf %157, %161 : vector<2x32xf32>
    %163 = vector.broadcast %c3_i32 : i32 to vector<2x1xi32>
    %164 = arith.cmpi slt, %163, %12 : vector<2x1xi32>
    %165 = vector.shape_cast %164 : vector<2x1xi1> to vector<2x1xi1>
    %166 = vector.broadcast %165 : vector<2x1xi1> to vector<2x32xi1>
    %167 = arith.select %166, %162, %128 : vector<2x32xi1>, vector<2x32xf32>
    %168 = vector.shape_cast %164 : vector<2x1xi1> to vector<2x1xi1>
    %169 = vector.broadcast %168 : vector<2x1xi1> to vector<2x32xi1>
    %170 = arith.select %169, %160, %131 : vector<2x32xi1>, vector<2x32xf32>
    %c4_i32 = arith.constant 4 : i32
    %c2_i32_39 = arith.constant 2 : i32
    %171 = arith.muli %c4_i32, %c2_i32_39 : i32
    %172 = tpu.assume_multiple %171, 2 : i32
    %173 = arith.index_cast %172 : i32 to index
    %c0_40 = arith.constant 0 : index
    %174 = vector.load %arg18[%173, %c0_40] : memref<16x128xf32, #tpu.memory_space<vmem>>, vector<2x128xf32>
    %cst_41 = arith.constant dense<0.000000e+00> : vector<2x128xf32>
    %175 = tpu.matmul %167, %11, %cst_41 {dimension_numbers = #tpu.dot_dimension_numbers<[1], [0], [0], [1], [0, 0, 1, 1], [], []>} : vector<2x32xf32>, vector<32x128xf32>, vector<2x128xf32> -> vector<2x128xf32>
    %176 = arith.addf %174, %175 : vector<2x128xf32>
    %177 = vector.extract_strided_slice %176 {offsets = [0, 0], sizes = [2, 32], strides = [1, 1]} : vector<2x128xf32> to vector<2x32xf32>
    %178 = arith.negf %177 : vector<2x32xf32>
    %179 = math.exp %178 : vector<2x32xf32>
    %cst_42 = arith.constant 1.000000e+00 : f32
    %180 = vector.broadcast %cst_42 : f32 to vector<2x32xf32>
    %181 = arith.addf %180, %179 : vector<2x32xf32>
    %182 = arith.divf %180, %181 : vector<2x32xf32>
    %183 = vector.extract_strided_slice %176 {offsets = [0, 32], sizes = [2, 32], strides = [1, 1]} : vector<2x128xf32> to vector<2x32xf32>
    %184 = arith.negf %183 : vector<2x32xf32>
    %185 = math.exp %184 : vector<2x32xf32>
    %cst_43 = arith.constant 1.000000e+00 : f32
    %186 = vector.broadcast %cst_43 : f32 to vector<2x32xf32>
    %187 = arith.addf %186, %185 : vector<2x32xf32>
    %188 = arith.divf %186, %187 : vector<2x32xf32>
    %189 = vector.extract_strided_slice %176 {offsets = [0, 64], sizes = [2, 32], strides = [1, 1]} : vector<2x128xf32> to vector<2x32xf32>
    %190 = math.tanh %189 : vector<2x32xf32>
    %191 = vector.extract_strided_slice %176 {offsets = [0, 96], sizes = [2, 32], strides = [1, 1]} : vector<2x128xf32> to vector<2x32xf32>
    %192 = arith.negf %191 : vector<2x32xf32>
    %193 = math.exp %192 : vector<2x32xf32>
    %cst_44 = arith.constant 1.000000e+00 : f32
    %194 = vector.broadcast %cst_44 : f32 to vector<2x32xf32>
    %195 = arith.addf %194, %193 : vector<2x32xf32>
    %196 = arith.divf %194, %195 : vector<2x32xf32>
    %197 = arith.mulf %188, %170 : vector<2x32xf32>
    %198 = arith.mulf %182, %190 : vector<2x32xf32>
    %199 = arith.addf %197, %198 : vector<2x32xf32>
    %200 = math.tanh %199 : vector<2x32xf32>
    %201 = arith.mulf %196, %200 : vector<2x32xf32>
    %202 = vector.broadcast %c4_i32 : i32 to vector<2x1xi32>
    %203 = arith.cmpi slt, %202, %12 : vector<2x1xi32>
    %204 = vector.shape_cast %203 : vector<2x1xi1> to vector<2x1xi1>
    %205 = vector.broadcast %204 : vector<2x1xi1> to vector<2x32xi1>
    %206 = arith.select %205, %201, %167 : vector<2x32xi1>, vector<2x32xf32>
    %207 = vector.shape_cast %203 : vector<2x1xi1> to vector<2x1xi1>
    %208 = vector.broadcast %207 : vector<2x1xi1> to vector<2x32xi1>
    %209 = arith.select %208, %199, %170 : vector<2x32xi1>, vector<2x32xf32>
    %c5_i32 = arith.constant 5 : i32
    %c2_i32_45 = arith.constant 2 : i32
    %210 = arith.muli %c5_i32, %c2_i32_45 : i32
    %211 = tpu.assume_multiple %210, 2 : i32
    %212 = arith.index_cast %211 : i32 to index
    %c0_46 = arith.constant 0 : index
    %213 = vector.load %arg18[%212, %c0_46] : memref<16x128xf32, #tpu.memory_space<vmem>>, vector<2x128xf32>
    %cst_47 = arith.constant dense<0.000000e+00> : vector<2x128xf32>
    %214 = tpu.matmul %206, %11, %cst_47 {dimension_numbers = #tpu.dot_dimension_numbers<[1], [0], [0], [1], [0, 0, 1, 1], [], []>} : vector<2x32xf32>, vector<32x128xf32>, vector<2x128xf32> -> vector<2x128xf32>
    %215 = arith.addf %213, %214 : vector<2x128xf32>
    %216 = vector.extract_strided_slice %215 {offsets = [0, 0], sizes = [2, 32], strides = [1, 1]} : vector<2x128xf32> to vector<2x32xf32>
    %217 = arith.negf %216 : vector<2x32xf32>
    %218 = math.exp %217 : vector<2x32xf32>
    %cst_48 = arith.constant 1.000000e+00 : f32
    %219 = vector.broadcast %cst_48 : f32 to vector<2x32xf32>
    %220 = arith.addf %219, %218 : vector<2x32xf32>
    %221 = arith.divf %219, %220 : vector<2x32xf32>
    %222 = vector.extract_strided_slice %215 {offsets = [0, 32], sizes = [2, 32], strides = [1, 1]} : vector<2x128xf32> to vector<2x32xf32>
    %223 = arith.negf %222 : vector<2x32xf32>
    %224 = math.exp %223 : vector<2x32xf32>
    %cst_49 = arith.constant 1.000000e+00 : f32
    %225 = vector.broadcast %cst_49 : f32 to vector<2x32xf32>
    %226 = arith.addf %225, %224 : vector<2x32xf32>
    %227 = arith.divf %225, %226 : vector<2x32xf32>
    %228 = vector.extract_strided_slice %215 {offsets = [0, 64], sizes = [2, 32], strides = [1, 1]} : vector<2x128xf32> to vector<2x32xf32>
    %229 = math.tanh %228 : vector<2x32xf32>
    %230 = vector.extract_strided_slice %215 {offsets = [0, 96], sizes = [2, 32], strides = [1, 1]} : vector<2x128xf32> to vector<2x32xf32>
    %231 = arith.negf %230 : vector<2x32xf32>
    %232 = math.exp %231 : vector<2x32xf32>
    %cst_50 = arith.constant 1.000000e+00 : f32
    %233 = vector.broadcast %cst_50 : f32 to vector<2x32xf32>
    %234 = arith.addf %233, %232 : vector<2x32xf32>
    %235 = arith.divf %233, %234 : vector<2x32xf32>
    %236 = arith.mulf %227, %209 : vector<2x32xf32>
    %237 = arith.mulf %221, %229 : vector<2x32xf32>
    %238 = arith.addf %236, %237 : vector<2x32xf32>
    %239 = math.tanh %238 : vector<2x32xf32>
    %240 = arith.mulf %235, %239 : vector<2x32xf32>
    %241 = vector.broadcast %c5_i32 : i32 to vector<2x1xi32>
    %242 = arith.cmpi slt, %241, %12 : vector<2x1xi32>
    %243 = vector.shape_cast %242 : vector<2x1xi1> to vector<2x1xi1>
    %244 = vector.broadcast %243 : vector<2x1xi1> to vector<2x32xi1>
    %245 = arith.select %244, %240, %206 : vector<2x32xi1>, vector<2x32xf32>
    %246 = vector.shape_cast %242 : vector<2x1xi1> to vector<2x1xi1>
    %247 = vector.broadcast %246 : vector<2x1xi1> to vector<2x32xi1>
    %248 = arith.select %247, %238, %209 : vector<2x32xi1>, vector<2x32xf32>
    %c6_i32 = arith.constant 6 : i32
    %c2_i32_51 = arith.constant 2 : i32
    %249 = arith.muli %c6_i32, %c2_i32_51 : i32
    %250 = tpu.assume_multiple %249, 2 : i32
    %251 = arith.index_cast %250 : i32 to index
    %c0_52 = arith.constant 0 : index
    %252 = vector.load %arg18[%251, %c0_52] : memref<16x128xf32, #tpu.memory_space<vmem>>, vector<2x128xf32>
    %cst_53 = arith.constant dense<0.000000e+00> : vector<2x128xf32>
    %253 = tpu.matmul %245, %11, %cst_53 {dimension_numbers = #tpu.dot_dimension_numbers<[1], [0], [0], [1], [0, 0, 1, 1], [], []>} : vector<2x32xf32>, vector<32x128xf32>, vector<2x128xf32> -> vector<2x128xf32>
    %254 = arith.addf %252, %253 : vector<2x128xf32>
    %255 = vector.extract_strided_slice %254 {offsets = [0, 0], sizes = [2, 32], strides = [1, 1]} : vector<2x128xf32> to vector<2x32xf32>
    %256 = arith.negf %255 : vector<2x32xf32>
    %257 = math.exp %256 : vector<2x32xf32>
    %cst_54 = arith.constant 1.000000e+00 : f32
    %258 = vector.broadcast %cst_54 : f32 to vector<2x32xf32>
    %259 = arith.addf %258, %257 : vector<2x32xf32>
    %260 = arith.divf %258, %259 : vector<2x32xf32>
    %261 = vector.extract_strided_slice %254 {offsets = [0, 32], sizes = [2, 32], strides = [1, 1]} : vector<2x128xf32> to vector<2x32xf32>
    %262 = arith.negf %261 : vector<2x32xf32>
    %263 = math.exp %262 : vector<2x32xf32>
    %cst_55 = arith.constant 1.000000e+00 : f32
    %264 = vector.broadcast %cst_55 : f32 to vector<2x32xf32>
    %265 = arith.addf %264, %263 : vector<2x32xf32>
    %266 = arith.divf %264, %265 : vector<2x32xf32>
    %267 = vector.extract_strided_slice %254 {offsets = [0, 64], sizes = [2, 32], strides = [1, 1]} : vector<2x128xf32> to vector<2x32xf32>
    %268 = math.tanh %267 : vector<2x32xf32>
    %269 = vector.extract_strided_slice %254 {offsets = [0, 96], sizes = [2, 32], strides = [1, 1]} : vector<2x128xf32> to vector<2x32xf32>
    %270 = arith.negf %269 : vector<2x32xf32>
    %271 = math.exp %270 : vector<2x32xf32>
    %cst_56 = arith.constant 1.000000e+00 : f32
    %272 = vector.broadcast %cst_56 : f32 to vector<2x32xf32>
    %273 = arith.addf %272, %271 : vector<2x32xf32>
    %274 = arith.divf %272, %273 : vector<2x32xf32>
    %275 = arith.mulf %266, %248 : vector<2x32xf32>
    %276 = arith.mulf %260, %268 : vector<2x32xf32>
    %277 = arith.addf %275, %276 : vector<2x32xf32>
    %278 = math.tanh %277 : vector<2x32xf32>
    %279 = arith.mulf %274, %278 : vector<2x32xf32>
    %280 = vector.broadcast %c6_i32 : i32 to vector<2x1xi32>
    %281 = arith.cmpi slt, %280, %12 : vector<2x1xi32>
    %282 = vector.shape_cast %281 : vector<2x1xi1> to vector<2x1xi1>
    %283 = vector.broadcast %282 : vector<2x1xi1> to vector<2x32xi1>
    %284 = arith.select %283, %279, %245 : vector<2x32xi1>, vector<2x32xf32>
    %285 = vector.shape_cast %281 : vector<2x1xi1> to vector<2x1xi1>
    %286 = vector.broadcast %285 : vector<2x1xi1> to vector<2x32xi1>
    %287 = arith.select %286, %277, %248 : vector<2x32xi1>, vector<2x32xf32>
    %c7_i32 = arith.constant 7 : i32
    %c2_i32_57 = arith.constant 2 : i32
    %288 = arith.muli %c7_i32, %c2_i32_57 : i32
    %289 = tpu.assume_multiple %288, 2 : i32
    %290 = arith.index_cast %289 : i32 to index
    %c0_58 = arith.constant 0 : index
    %291 = vector.load %arg18[%290, %c0_58] : memref<16x128xf32, #tpu.memory_space<vmem>>, vector<2x128xf32>
    %cst_59 = arith.constant dense<0.000000e+00> : vector<2x128xf32>
    %292 = tpu.matmul %284, %11, %cst_59 {dimension_numbers = #tpu.dot_dimension_numbers<[1], [0], [0], [1], [0, 0, 1, 1], [], []>} : vector<2x32xf32>, vector<32x128xf32>, vector<2x128xf32> -> vector<2x128xf32>
    %293 = arith.addf %291, %292 : vector<2x128xf32>
    %294 = vector.extract_strided_slice %293 {offsets = [0, 0], sizes = [2, 32], strides = [1, 1]} : vector<2x128xf32> to vector<2x32xf32>
    %295 = arith.negf %294 : vector<2x32xf32>
    %296 = math.exp %295 : vector<2x32xf32>
    %cst_60 = arith.constant 1.000000e+00 : f32
    %297 = vector.broadcast %cst_60 : f32 to vector<2x32xf32>
    %298 = arith.addf %297, %296 : vector<2x32xf32>
    %299 = arith.divf %297, %298 : vector<2x32xf32>
    %300 = vector.extract_strided_slice %293 {offsets = [0, 32], sizes = [2, 32], strides = [1, 1]} : vector<2x128xf32> to vector<2x32xf32>
    %301 = arith.negf %300 : vector<2x32xf32>
    %302 = math.exp %301 : vector<2x32xf32>
    %cst_61 = arith.constant 1.000000e+00 : f32
    %303 = vector.broadcast %cst_61 : f32 to vector<2x32xf32>
    %304 = arith.addf %303, %302 : vector<2x32xf32>
    %305 = arith.divf %303, %304 : vector<2x32xf32>
    %306 = vector.extract_strided_slice %293 {offsets = [0, 64], sizes = [2, 32], strides = [1, 1]} : vector<2x128xf32> to vector<2x32xf32>
    %307 = math.tanh %306 : vector<2x32xf32>
    %308 = vector.extract_strided_slice %293 {offsets = [0, 96], sizes = [2, 32], strides = [1, 1]} : vector<2x128xf32> to vector<2x32xf32>
    %309 = arith.negf %308 : vector<2x32xf32>
    %310 = math.exp %309 : vector<2x32xf32>
    %cst_62 = arith.constant 1.000000e+00 : f32
    %311 = vector.broadcast %cst_62 : f32 to vector<2x32xf32>
    %312 = arith.addf %311, %310 : vector<2x32xf32>
    %313 = arith.divf %311, %312 : vector<2x32xf32>
    %314 = arith.mulf %305, %287 : vector<2x32xf32>
    %315 = arith.mulf %299, %307 : vector<2x32xf32>
    %316 = arith.addf %314, %315 : vector<2x32xf32>
    %317 = math.tanh %316 : vector<2x32xf32>
    %318 = arith.mulf %313, %317 : vector<2x32xf32>
    %319 = vector.broadcast %c7_i32 : i32 to vector<2x1xi32>
    %320 = arith.cmpi slt, %319, %12 : vector<2x1xi32>
    %321 = vector.shape_cast %320 : vector<2x1xi1> to vector<2x1xi1>
    %322 = vector.broadcast %321 : vector<2x1xi1> to vector<2x32xi1>
    %323 = arith.select %322, %318, %284 : vector<2x32xi1>, vector<2x32xf32>
    %324 = vector.shape_cast %320 : vector<2x1xi1> to vector<2x1xi1>
    %325 = vector.broadcast %324 : vector<2x1xi1> to vector<2x32xi1>
    %326 = arith.select %325, %316, %287 : vector<2x32xi1>, vector<2x32xf32>
    %c8_i32 = arith.constant 8 : i32
    %c0_i32_63 = arith.constant 0 : i32
    %327 = tpu.memref_slice %arg21[%c0_i32_63] : memref<2x!tpu.dma_semaphore, #tpu.memory_space<semaphore_mem>> -> memref<1x!tpu.dma_semaphore, #tpu.memory_space<semaphore_mem>>
    %328 = tpu.memref_squeeze %327 : memref<1x!tpu.dma_semaphore, #tpu.memory_space<semaphore_mem>> -> memref<!tpu.dma_semaphore, #tpu.memory_space<semaphore_mem>>
    tpu.wait_dma2 semaphore(%328 : memref<!tpu.dma_semaphore, #tpu.memory_space<semaphore_mem>>) src(%arg6 : memref<64x1024xbf16, #tpu.memory_space<any>>) dst(%arg19 : memref<64x1024xbf16, #tpu.memory_space<vmem>>)
    %c0_64 = arith.constant 0 : index
    %c0_65 = arith.constant 0 : index
    %329 = vector.load %arg2[%c0_64, %c0_65] : memref<2x64xf32, #tpu.memory_space<vmem>>, vector<2x64xf32>
    %330 = arith.truncf %329 : vector<2x64xf32> to vector<2x64xbf16>
    %c0_66 = arith.constant 0 : index
    %c0_67 = arith.constant 0 : index
    %331 = vector.load %arg19[%c0_66, %c0_67] : memref<64x1024xbf16, #tpu.memory_space<vmem>>, vector<64x1024xbf16>
    %cst_68 = arith.constant dense<0.000000e+00> : vector<2x1024xf32>
    %332 = tpu.matmul %330, %331, %cst_68 {dimension_numbers = #tpu.dot_dimension_numbers<[1], [0], [0], [1], [0, 0, 1, 1], [], []>} : vector<2x64xbf16>, vector<64x1024xbf16>, vector<2x1024xf32> -> vector<2x1024xf32>
    %c0_69 = arith.constant 0 : index
    %c0_70 = arith.constant 0 : index
    %333 = vector.load %arg7[%c0_69, %c0_70] : memref<1x1024xf32, #tpu.memory_space<vmem>>, vector<1x1024xf32>
    %334 = vector.broadcast %333 : vector<1x1024xf32> to vector<2x1024xf32>
    %335 = arith.addf %332, %334 : vector<2x1024xf32>
    %cst_71 = arith.constant 0.000000e+00 : f32
    %336 = vector.broadcast %cst_71 : f32 to vector<2x1024xf32>
    %337 = arith.maximumf %335, %336 : vector<2x1024xf32>
    %c1_i32_72 = arith.constant 1 : i32
    %338 = tpu.memref_slice %arg21[%c1_i32_72] : memref<2x!tpu.dma_semaphore, #tpu.memory_space<semaphore_mem>> -> memref<1x!tpu.dma_semaphore, #tpu.memory_space<semaphore_mem>>
    %339 = tpu.memref_squeeze %338 : memref<1x!tpu.dma_semaphore, #tpu.memory_space<semaphore_mem>> -> memref<!tpu.dma_semaphore, #tpu.memory_space<semaphore_mem>>
    tpu.wait_dma2 semaphore(%339 : memref<!tpu.dma_semaphore, #tpu.memory_space<semaphore_mem>>) src(%arg8 : memref<1024x512xbf16, #tpu.memory_space<any>>) dst(%arg20 : memref<1024x512xbf16, #tpu.memory_space<vmem>>)
    %340 = arith.truncf %337 : vector<2x1024xf32> to vector<2x1024xbf16>
    %c0_73 = arith.constant 0 : index
    %c0_74 = arith.constant 0 : index
    %341 = vector.load %arg20[%c0_73, %c0_74] : memref<1024x512xbf16, #tpu.memory_space<vmem>>, vector<1024x512xbf16>
    %cst_75 = arith.constant dense<0.000000e+00> : vector<2x512xf32>
    %342 = tpu.matmul %340, %341, %cst_75 {dimension_numbers = #tpu.dot_dimension_numbers<[1], [0], [0], [1], [0, 0, 1, 1], [], []>} : vector<2x1024xbf16>, vector<1024x512xbf16>, vector<2x512xf32> -> vector<2x512xf32>
    %c0_76 = arith.constant 0 : index
    %c0_77 = arith.constant 0 : index
    %343 = vector.load %arg9[%c0_76, %c0_77] : memref<1x512xf32, #tpu.memory_space<vmem>>, vector<1x512xf32>
    %344 = vector.broadcast %343 : vector<1x512xf32> to vector<2x512xf32>
    %345 = arith.addf %342, %344 : vector<2x512xf32>
    %cst_78 = arith.constant 0.000000e+00 : f32
    %346 = vector.broadcast %cst_78 : f32 to vector<2x512xf32>
    %347 = arith.maximumf %345, %346 : vector<2x512xf32>
    %c0_79 = arith.constant 0 : index
    %c0_80 = arith.constant 0 : index
    %348 = vector.load %arg10[%c0_79, %c0_80] : memref<512x32xf32, #tpu.memory_space<vmem>>, vector<512x32xf32>
    %cst_81 = arith.constant dense<0.000000e+00> : vector<2x32xf32>
    %349 = tpu.matmul %347, %348, %cst_81 {dimension_numbers = #tpu.dot_dimension_numbers<[1], [0], [0], [1], [0, 0, 1, 1], [], []>} : vector<2x512xf32>, vector<512x32xf32>, vector<2x32xf32> -> vector<2x32xf32>
    %c0_82 = arith.constant 0 : index
    %c0_83 = arith.constant 0 : index
    %350 = vector.load %arg11[%c0_82, %c0_83] : memref<1x32xf32, #tpu.memory_space<vmem>>, vector<1x32xf32>
    %351 = vector.broadcast %350 : vector<1x32xf32> to vector<2x32xf32>
    %352 = arith.addf %349, %351 : vector<2x32xf32>
    %353 = vector.extract_strided_slice %352 {offsets = [0, 0], sizes = [2, 16], strides = [1, 1]} : vector<2x32xf32> to vector<2x16xf32>
    %354 = vector.extract_strided_slice %352 {offsets = [0, 16], sizes = [2, 16], strides = [1, 1]} : vector<2x32xf32> to vector<2x16xf32>
    %c0_84 = arith.constant 0 : index
    %c0_85 = arith.constant 0 : index
    %355 = vector.load %arg16[%c0_84, %c0_85] : memref<1x16xf32, #tpu.memory_space<vmem>>, vector<1x16xf32>
    %356 = vector.broadcast %355 : vector<1x16xf32> to vector<2x16xf32>
    %357 = arith.mulf %356, %354 : vector<2x16xf32>
    %358 = arith.addf %353, %357 : vector<2x16xf32>
    %c0_86 = arith.constant 0 : index
    %c0_87 = arith.constant 0 : index
    %359 = vector.load %arg12[%c0_86, %c0_87] : memref<32x16xf32, #tpu.memory_space<vmem>>, vector<32x16xf32>
    %cst_88 = arith.constant dense<0.000000e+00> : vector<2x16xf32>
    %360 = tpu.matmul %323, %359, %cst_88 {dimension_numbers = #tpu.dot_dimension_numbers<[1], [0], [0], [1], [0, 0, 1, 1], [], []>} : vector<2x32xf32>, vector<32x16xf32>, vector<2x16xf32> -> vector<2x16xf32>
    %c0_89 = arith.constant 0 : index
    %c0_90 = arith.constant 0 : index
    %361 = vector.load %arg13[%c0_89, %c0_90] : memref<1x16xf32, #tpu.memory_space<vmem>>, vector<1x16xf32>
    %362 = vector.broadcast %361 : vector<1x16xf32> to vector<2x16xf32>
    %363 = arith.addf %360, %362 : vector<2x16xf32>
    %364 = arith.addf %363, %358 : vector<2x16xf32>
    %c0_91 = arith.constant 0 : index
    %c0_92 = arith.constant 0 : index
    %365 = vector.load %arg14[%c0_91, %c0_92] : memref<16x128xf32, #tpu.memory_space<vmem>>, vector<16x128xf32>
    %cst_93 = arith.constant dense<0.000000e+00> : vector<2x128xf32>
    %366 = tpu.matmul %364, %365, %cst_93 {dimension_numbers = #tpu.dot_dimension_numbers<[1], [0], [0], [1], [0, 0, 1, 1], [], []>} : vector<2x16xf32>, vector<16x128xf32>, vector<2x128xf32> -> vector<2x128xf32>
    %c0_94 = arith.constant 0 : index
    %c0_95 = arith.constant 0 : index
    %367 = vector.load %arg15[%c0_94, %c0_95] : memref<1x128xf32, #tpu.memory_space<vmem>>, vector<1x128xf32>
    %368 = vector.broadcast %367 : vector<1x128xf32> to vector<2x128xf32>
    %369 = arith.addf %366, %368 : vector<2x128xf32>
    %c0_96 = arith.constant 0 : index
    %c0_97 = arith.constant 0 : index
    %370 = vector.load %arg17[%c0_96, %c0_97] : memref<2x128xf32, #tpu.memory_space<vmem>>, vector<2x128xf32>
    tpu.vector_store %arg17[%c0_96, %c0_97], %369 {strides = array<i32>} : memref<2x128xf32, #tpu.memory_space<vmem>>, vector<2x128xf32>,
    return
  }
}

</mosaic_0001>

<bundles_post_ra>
// kernel: lstm_vae_forward.1
= control target key start
LH: loop header
LB: loop body
LE: loop exit
PB: predicated region body
PF: predicated region fallthrough
CT: control target
= control target key end

     0   :  { %s5853_s0 = inlined_call_operand.vmem [shape: f32[16,32], index: 0, kind: input, shape index: {}]   ;;  %s5854_s1 = inlined_call_operand.vmem [shape: s32[2,1], index: 1, kind: input, shape index: {}]   ;;  %s5855_s2 = inlined_call_operand.vmem [shape: f32[2,64], index: 2, kind: input, shape index: {}]   ;;  %s5856_s3 = inlined_call_operand.vmem [shape: f32[32,128], index: 3, kind: input, shape index: {}]   ;;  %s5857_s4 = inlined_call_operand.vmem [shape: f32[32,128], index: 4, kind: input, shape index: {}]   ;;  %s5858_s5 = inlined_call_operand.vmem [shape: f32[1,128], index: 5, kind: input, shape index: {}]   ;;  %s5859_s6 = inlined_call_operand.vmem [shape: bf16[64,1024], index: 6, kind: input, shape index: {}]   ;;  %s5860_s7 = inlined_call_operand.vmem [shape: f32[1,1024], index: 7, kind: input, shape index: {}]   ;;  %s5861_s8 = inlined_call_operand.hbm [shape: bf16[1024,512], index: 8, kind: input, shape index: {}]   ;;  %s5862_s9 = inlined_call_operand.vmem [shape: f32[1,512], index: 9, kind: input, shape index: {}]   ;;  %s5863_s10 = inlined_call_operand.vmem [shape: f32[512,32], index: 10, kind: input, shape index: {}]   ;;  %s5864_s11 = inlined_call_operand.vmem [shape: f32[1,32], index: 11, kind: input, shape index: {}]   ;;  %s5865_s12 = inlined_call_operand.vmem [shape: f32[32,16], index: 12, kind: input, shape index: {}]   ;;  %s5866_s13 = inlined_call_operand.vmem [shape: f32[1,16], index: 13, kind: input, shape index: {}]   ;;  %s5867_s14 = inlined_call_operand.vmem [shape: f32[16,128], index: 14, kind: input, shape index: {}]   ;;  %s5868_s15 = inlined_call_operand.vmem [shape: f32[1,128], index: 15, kind: input, shape index: {}]   ;;  %s5869_s16 = inlined_call_operand.vmem [shape: f32[1,16], index: 16, kind: input, shape index: {}]   ;;  %s5870_s17 = inlined_call_operand.hbm [shape: f32[2,128], index: 17, kind: output, shape index: {}]  }
   0x1   :  { %5872 = sst [smem:[#allocation16_spill]] %s5853_s0 }
   0x2   :  { %5873 = sst [smem:[#allocation17_spill]] %s5854_s1 }
   0x3   :  { %22 = vsyncpa [#allocation7], 0  ;;  %v5061_v0 = vld [vmem:[%s5859_s6] sm:$0xff]  ;;  %v5066_v1 = vld [vmem:[%s5859_s6 + $0x8] sm:$0xff]  ;;  %vm184_vm0 = vcmask 261120   ;;  %s5874_s1 = sld [smem:[#allocation16_spill]] }
   0x4   :  { %v5071_v2 = vld [vmem:[%s5859_s6 + $0x10] sm:$0xff]  ;;  %v5076_v3 = vld [vmem:[%s5859_s6 + $0x18] sm:$0xff]  ;;  %v5081_v4 = vld [vmem:[%s5859_s6 + $0x20] sm:$0xff]  ;;  %v4960_v35 = vmov 0.0  }
   0x5   :  { %v5086_v5 = vld [vmem:[%s5859_s6 + $0x28] sm:$0xff]  ;;  %v5091_v6 = vld [vmem:[%s5859_s6 + $0x30] sm:$0xff]  ;;  %v5096_v7 = vld [vmem:[%s5859_s6 + $0x38] sm:$0xff]  ;;  %4350 = vmatprep.subr.mxu1 %v4960_v35 }
   0x6   :  { %v5101_v8 = vld [vmem:[%s5859_s6 + $0x40] sm:$0xff]  ;;  %v5106_v9 = vld [vmem:[%s5859_s6 + $0x48] sm:$0xff]  ;;  %v5111_v10 = vld [vmem:[%s5859_s6 + $0x50] sm:$0xff] }
   0x7   :  { %v5116_v11 = vld [vmem:[%s5859_s6 + $0x58] sm:$0xff]  ;;  %v5121_v12 = vld [vmem:[%s5859_s6 + $0x60] sm:$0xff]  ;;  %v5126_v13 = vld [vmem:[%s5859_s6 + $0x68] sm:$0xff] }
   0x8   :  { %v5131_v14 = vld [vmem:[%s5859_s6 + $0x70] sm:$0xff]  ;;  %v5136_v15 = vld [vmem:[%s5859_s6 + $0x78] sm:$0xff]  ;;  %v5141_v16 = vld [vmem:[%s5859_s6 + $0x80] sm:$0xff] }
   0x9   :  { %v5146_v17 = vld [vmem:[%s5859_s6 + $0x88] sm:$0xff]  ;;  %v5151_v18 = vld [vmem:[%s5859_s6 + $0x90] sm:$0xff]  ;;  %v5156_v19 = vld [vmem:[%s5859_s6 + $0x98] sm:$0xff] }
   0xa   :  { %v5161_v20 = vld [vmem:[%s5859_s6 + $0xa0] sm:$0xff]  ;;  %v5166_v21 = vld [vmem:[%s5859_s6 + $0xa8] sm:$0xff]  ;;  %v5171_v22 = vld [vmem:[%s5859_s6 + $0xb0] sm:$0xff] }
   0xb   :  { %v5176_v23 = vld [vmem:[%s5859_s6 + $0xb8] sm:$0xff]  ;;  %v5181_v24 = vld [vmem:[%s5859_s6 + $0xc0] sm:$0xff]  ;;  %v5186_v25 = vld [vmem:[%s5859_s6 + $0xc8] sm:$0xff] }
   0xc   :  { %v5191_v26 = vld [vmem:[%s5859_s6 + $0xd0] sm:$0xff]  ;;  %v5196_v27 = vld [vmem:[%s5859_s6 + $0xd8] sm:$0xff]  ;;  %v5201_v28 = vld [vmem:[%s5859_s6 + $0xe0] sm:$0xff] }
   0xd   :  { %v5206_v29 = vld [vmem:[%s5859_s6 + $0xe8] sm:$0xff]  ;;  %v5211_v30 = vld [vmem:[%s5859_s6 + $0xf0] sm:$0xff]  ;;  %v5216_v31 = vld [vmem:[%s5859_s6 + $0xf8] sm:$0xff] }
   0xe   :  { %v176_v32 = vld [vmem:[%s5856_s3 + $0x18] sm:$0xff]  ;;  %v175_v33 = vld [vmem:[%s5856_s3 + $0x10] sm:$0xff]  ;;  %v171_v34 = vld [vmem:[%s5874_s1] sm:$0xff] }
   0xf   :  { %4339 = vmatprep.subr.mxu0 %v176_v32  ;;  %v174_v36 = vld [vmem:[%s5856_s3 + $0x8] sm:$0xff]  ;;  %4347 = vmatprep.mubr.msk.f32.mxu0 %vm184_vm0, %v171_v34  ;;  %v5235_v37 = vld [vmem:[%s5857_s4 + $0x18] sm:$0xff]  ;;  %v5240_v38 = vld [vmem:[%s5857_s4 + $0x10] sm:$0xff] }
  0x10   :  { %4340 = vmatpush3.msra.mxu0 %v176_v32  ;;  %4351 = vmatpush3.msra.mxu1 %v5235_v37 }
  0x11   :  { %4341 = vmatprep.subr.mxu0 %v175_v33 }
  0x12   :  { %158 = vsyncadd [#allocation5], 4096  ;;  %4342 = vmatpush3.msra.mxu0 %v175_v33  ;;  %v173_v39 = vld [vmem:[%s5856_s3] sm:$0xff]  ;;  %4352 = vmatprep.subr.mxu1 %v4960_v35  ;;  %v5250_v40 = vld [vmem:[%s5857_s4 + $0x8] sm:$0xff]  ;;  %vm4961_vm1 = vmmov 0   ;;  %s5875_s19 = sld [smem:[#allocation17_spill]] }
  0x13   :  { %4343 = vmatprep.subr.mxu0 %v174_v36  ;;  %4353 = vmatpush3.msra.mxu1 %v5240_v38  ;;  %v172_v41 = vld [vmem:[%s5874_s1 + $0x8] sm:$0xff]  ;;  %v5260_v42 = vld [vmem:[%s5857_s4] sm:$0xff]  ;;  %v4962_v44 = vmov 0   ;;  %s4963_s20 = smov 64   ;;  %s4965_s21 = smov [#allocation4]  }
  0x14   :  { %4344 = vmatpush3.msra.mxu0 %v174_v36  ;;  %4354 = vmatprep.subr.mxu1 %v4960_v35  ;;  %v3897_v46 = vld [vmem:[%s5858_s5] ss:$0 sm:$0xff]  ;;  %s4964_s5 = smov 32   ;;  %s167_s22 = sshll.u32 %s4965_s21, 4  ;;  %s168_s22 = int_to_ptr.vmem [resolvable:$true] %s167_s22 }
  0x15   :  { %4345 = vmatprep.subr.mxu0 %v173_v39  ;;  %4355 = vmatpush3.msra.mxu1 %v5250_v40  ;;  %s4922_s23 = scalar_lea.vmem %s168_s22, 32768  ;;  %p4927_p1 = scmp.lt.s32.totalorder %s168_s22, %s168_s22 }
  0x16   :  { %4346 = vmatpush3.msra.mxu0 %v173_v39  ;;  %4356 = vmatprep.subr.mxu1 %v4960_v35  ;;  %p4923_p0 = scmp.ne.s32.totalorder %s168_s22, %s4922_s23  ;;  %p4928_p2 = scmp.lt.s32.totalorder %s4922_s23, %s4922_s23 }
  0x17   :  { %4348 = vmatmul.mubr.msk.f32.vlgmr.msra.gmra.mxu0 %vm184_vm0, %v172_v41  ;;  %4357 = vmatpush3.msra.mxu1 %v5260_v42 }
  0x18   :  { %4358 = vmatprep.mubr.msk.f32.mxu1 %vm4961_vm1, %v4960_v35  ;;  %4361 = vmatprep.subr.mxu0 %v4960_v35  ;;  %v5294_v43 = vld [vmem:[%s5875_s19] sm:$0x3]  ;;  %p4929_p3 = por %p4928_p2, %p4927_p1 }
  0x19   :  { %4359 = vmatmul.mubr.f32.vlgmr.msra.gmra.mxu1 %v4960_v35  ;;  %4362 = vmatpush3.msra.mxu0 %v5235_v37  ;;  %vm372_vm2 = vcmp.gt.s32.totalorder %v5294_v43, 0  ;;  %vm482_vm4 = vcmp.gt.s32.totalorder %v5294_v43, 1  ;;  %vm592_vm6 = vcmp.gt.s32.totalorder %v5294_v43, 2  ;;  %vm702_vm8 = vcmp.gt.s32.totalorder %v5294_v43, 3 }
  0x1a   :  { %4363 = vmatprep.subr.mxu0 %v4960_v35  ;;  %4369 = vmatprep.mubr.msk.f32.mxu0 %vm4961_vm1, %v4960_v35  ;;  %v373_v45 = vsel %vm372_vm2, 1, %v4962_v44  ;;  %vm812_vm10 = vcmp.gt.s32.totalorder %v5294_v43, 4  ;;  %vm922_vm12 = vcmp.gt.s32.totalorder %v5294_v43, 5  ;;  %vm1032_vm14 = vcmp.gt.s32.totalorder %v5294_v43, 6  ;;  %p4930_p4 = pnand %p4929_p3, %p4923_p0 }
  0x1b   :  { %4364 = vmatpush3.msra.mxu0 %v5240_v38  ;;  %4372 = vmatprep.subr.mxu1 %v4960_v35  ;;  %vm1142_vm2 = vcmp.gt.s32.totalorder %v5294_v43, 7 }
  0x1c   :  { %4365 = vmatprep.subr.mxu0 %v4960_v35  ;;  %4373 = vmatpush3.msra.mxu1 %v5235_v37 }
  0x1d   :  { %4366 = vmatpush3.msra.mxu0 %v5250_v40  ;;  %4374 = vmatprep.subr.mxu1 %v4960_v35 }
  0x1e   :  { %4367 = vmatprep.subr.mxu0 %v4960_v35  ;;  %4375 = vmatpush3.msra.mxu1 %v5240_v38 }
  0x1f   :  { %4368 = vmatpush3.msra.mxu0 %v5260_v42  ;;  %4376 = vmatprep.subr.mxu1 %v4960_v35 }
  0x20   :  { %4377 = vmatpush3.msra.mxu1 %v5250_v40  ;;  %4380 = vmatprep.mubr.msk.f32.mxu1 %vm4961_vm1, %v4960_v35 }
  0x21   :  { %4378 = vmatprep.subr.mxu1 %v4960_v35  ;;  %4383 = vmatprep.subr.mxu0 %v4960_v35 }
  0x22   :  { %4379 = vmatpush3.msra.mxu1 %v5260_v42  ;;  %4464 = vset.pattern.permute.xlu1 %v4962_v44 }
  0x23   :  { %4394 = vmatprep.subr.mxu1 %v4960_v35  ;;  %4465 = vset.pattern.permute.xlu0 %v4962_v44 }
  0x24   :  { %375 = vperm.xlu1 %4464, %v373_v45  }
  0x9f   :  { %v376_v34 = vpop.permute.xlu1 %375 }
  0xa0   :  { %vm377_vm3 = vcmp.eq.s32.totalorder %v376_v34, 1 }
  0xd7   :  { %v4349_v47 = vpop.f32.mrf.mxu0 }
  0xd8   :  { %v263_v48 = vadd.f32 %v4349_v47, %v3897_v46 }
  0xd9   :  { %v257_v49 = vpop.f32.mrf.mxu0  ;;  %v343_v50 = vpop.f32.mrf.mxu1 }
  0xda   :  { %267 = vst [vmem:[#allocation2 + $0x8] sm:$0xff] %v263_v48  ;;  %v258_v51 = vadd.f32 %v3897_v46, %v257_v49 }
  0xdb   :  { %v4360_v52 = vpop.f32.mrf.mxu1 }
  0xdc   :  { %266 = vst [vmem:[#allocation2] sm:$0xff] %v258_v51  ;;  %v483_v51 = vsel %vm482_vm4, 1, %v4962_v44 }
  0xe3   :  { %v273_v53 = vld [vmem:[#allocation2] sm:$0x3]  ;;  %v381_v46 = vld [vmem:[#allocation2 + $0x2] sm:$0x3] }
  0xe4   :  { %v347_v54 = vadd.f32 %v343_v50, %v273_v53 }
  0xe6   :  { %4466 = vtanh.f32 %v347_v54  ;;  %v3900_v56 = vmul.f32 -1.442695, %v347_v54 }
  0xe8   :  { %4468 = vpow2.f32 %v3900_v56 }
  0xf3   :  { %v4467_v55 = vpop.eup %4466 }
  0xf4   :  { %357 = vrot.lane.b32.xlu0 %v4467_v55, %s4963_s20 }
  0xf5   :  { %v4469_v57 = vpop.eup %4468 }
  0xf6   :  { %v351_v58 = vadd.f32 1.0, %v4469_v57 }
  0xf8   :  { %4470 = vrcp.f32 %v351_v58 }
 0x105   :  { %v4471_v59 = vpop.eup %4470 }
 0x106   :  { %v355_v62 = vmul.f32 0.0, %v4471_v59 }
 0x166   :  { %v358_v60 = vpop.permute.xlu0 %357 }
 0x167   :  { %v360_v61 = vmul.f32 %v4471_v59, %v358_v60 }
 0x169   :  { %362 = vrot.lane.b32.xlu0 %v360_v61, %s4964_s5 }
 0x1db   :  { %v363_v63 = vpop.permute.xlu0 %362 }
 0x1dc   :  { %v365_v32 = vadd.f32 %v363_v63, %v355_v62 }
 0x1de   :  { %4472 = vtanh.f32 %v365_v32  ;;  %v379_v58 = vsel %vm377_vm3, %v365_v32, 0.0  ;;  %v491_v32 = vld [vmem:[#allocation2 + $0x4] sm:$0x3] }
 0x1eb   :  { %v4473_v33 = vpop.eup %4472 }
 0x1ec   :  { %368 = vrot.lane.b32.xlu1 %v4473_v33, %s4963_s20 }
 0x25e   :  { %v369_v36 = vpop.permute.xlu1 %368 }
 0x25f   :  { %v371_v39 = vmul.f32 %v4471_v59, %v369_v36 }
 0x261   :  { %v378_v41 = vsel %vm377_vm3, %v371_v39, 0.0 }
 0x262   :  { %383 = vrot.lane.b32.xlu0 %v378_v41, %s4964_s5 }
 0x2d4   :  { %v384_v45 = vpop.permute.xlu0 %383 }
 0x2d5   :  { %4370 = vmatmul.mubr.msk.f32.vlgmr.msra.gmra.mxu0 %vm184_vm0, %v384_v45 }
 0x2d6   :  { %4384 = vmatpush3.msra.mxu0 %v5235_v37  ;;  %4391 = vmatprep.mubr.msk.f32.mxu0 %vm4961_vm1, %v4960_v35 }
 0x2d7   :  { %4385 = vmatprep.subr.mxu0 %v4960_v35 }
 0x2d8   :  { %4386 = vmatpush3.msra.mxu0 %v5240_v38 }
 0x2d9   :  { %4387 = vmatprep.subr.mxu0 %v4960_v35 }
 0x2da   :  { %4388 = vmatpush3.msra.mxu0 %v5250_v40 }
 0x2db   :  { %4389 = vmatprep.subr.mxu0 %v4960_v35 }
 0x2dc   :  { %4390 = vmatpush3.msra.mxu0 %v5260_v42 }
 0x2dd   :  { %4405 = vmatprep.subr.mxu0 %v4960_v35 }
 0x395   :  { %v453_v47 = vpop.f32.mrf.mxu0 }
 0x396   :  { %v457_v48 = vadd.f32 %v453_v47, %v381_v46 }
 0x397   :  { %v4371_v49 = vpop.f32.mrf.mxu0 }
 0x398   :  { %4474 = vtanh.f32 %v457_v48  ;;  %v3902_v52 = vmul.f32 -1.442695, %v457_v48  ;;  %v593_v48 = vsel %vm592_vm6, 1, %v4962_v44 }
 0x39a   :  { %4476 = vpow2.f32 %v3902_v52 }
 0x3a5   :  { %v4475_v50 = vpop.eup %4474 }
 0x3a6   :  { %467 = vrot.lane.b32.xlu1 %v4475_v50, %s4963_s20 }
 0x3a7   :  { %v4477_v53 = vpop.eup %4476 }
 0x3a8   :  { %v461_v54 = vadd.f32 1.0, %v4477_v53 }
 0x3aa   :  { %485 = vperm.xlu1 %4464, %v483_v51   ;;  %4478 = vrcp.f32 %v461_v54 }
 0x3b7   :  { %v4479_v55 = vpop.eup %4478 }
 0x3b8   :  { %v465_v59 = vmul.f32 %v4479_v55, %v379_v58 }
 0x418   :  { %v468_v56 = vpop.permute.xlu1 %467 }
 0x419   :  { %v470_v57 = vmul.f32 %v4479_v55, %v468_v56 }
 0x41b   :  { %472 = vrot.lane.b32.xlu0 %v470_v57, %s4964_s5 }
 0x425   :  { %v486_v63 = vpop.permute.xlu1 %485 }
 0x426   :  { %vm487_vm5 = vcmp.eq.s32.totalorder %v486_v63, 1 }
 0x48d   :  { %v473_v60 = vpop.permute.xlu0 %472 }
 0x48e   :  { %v475_v61 = vadd.f32 %v473_v60, %v465_v59 }
 0x490   :  { %4480 = vtanh.f32 %v475_v61 }
 0x49d   :  { %v4481_v62 = vpop.eup %4480 }
 0x49e   :  { %478 = vrot.lane.b32.xlu0 %v4481_v62, %s4963_s20 }
 0x510   :  { %v479_v33 = vpop.permute.xlu0 %478 }
 0x511   :  { %v481_v36 = vmul.f32 %v4479_v55, %v479_v33  ;;  %v489_v55 = vsel %vm487_vm5, %v475_v61, %v379_v58  ;;  %v601_v58 = vld [vmem:[#allocation2 + $0x6] sm:$0x3] }
 0x513   :  { %v488_v39 = vsel %vm487_vm5, %v481_v36, %v378_v41 }
 0x514   :  { %493 = vrot.lane.b32.xlu1 %v488_v39, %s4964_s5 }
 0x586   :  { %v494_v45 = vpop.permute.xlu1 %493 }
 0x587   :  { %4381 = vmatmul.mubr.msk.f32.vlgmr.msra.gmra.mxu1 %vm184_vm0, %v494_v45 }
 0x588   :  { %4395 = vmatpush3.msra.mxu1 %v5235_v37  ;;  %4402 = vmatprep.mubr.msk.f32.mxu1 %vm4961_vm1, %v4960_v35 }
 0x589   :  { %4396 = vmatprep.subr.mxu1 %v4960_v35 }
 0x58a   :  { %4397 = vmatpush3.msra.mxu1 %v5240_v38 }
 0x58b   :  { %4398 = vmatprep.subr.mxu1 %v4960_v35 }
 0x58c   :  { %4399 = vmatpush3.msra.mxu1 %v5250_v40 }
 0x58d   :  { %4400 = vmatprep.subr.mxu1 %v4960_v35 }
 0x58e   :  { %4401 = vmatpush3.msra.mxu1 %v5260_v42 }
 0x58f   :  { %4416 = vmatprep.subr.mxu1 %v4960_v35 }
 0x647   :  { %v563_v34 = vpop.f32.mrf.mxu1 }
 0x648   :  { %v567_v41 = vadd.f32 %v563_v34, %v491_v32 }
 0x649   :  { %v4382_v46 = vpop.f32.mrf.mxu1 }
 0x64a   :  { %4482 = vtanh.f32 %v567_v41  ;;  %v3904_v49 = vmul.f32 -1.442695, %v567_v41  ;;  %v703_v41 = vsel %vm702_vm8, 1, %v4962_v44 }
 0x64c   :  { %4484 = vpow2.f32 %v3904_v49 }
 0x657   :  { %v4483_v47 = vpop.eup %4482 }
 0x658   :  { %577 = vrot.lane.b32.xlu0 %v4483_v47, %s4963_s20 }
 0x659   :  { %v4485_v50 = vpop.eup %4484 }
 0x65a   :  { %v571_v51 = vadd.f32 1.0, %v4485_v50 }
 0x65c   :  { %595 = vperm.xlu0 %4465, %v593_v48   ;;  %4486 = vrcp.f32 %v571_v51 }
 0x669   :  { %v4487_v52 = vpop.eup %4486 }
 0x66a   :  { %v575_v56 = vmul.f32 %v4487_v52, %v489_v55 }
 0x6ca   :  { %v578_v53 = vpop.permute.xlu0 %577 }
 0x6cb   :  { %v580_v54 = vmul.f32 %v4487_v52, %v578_v53 }
 0x6cd   :  { %582 = vrot.lane.b32.xlu1 %v580_v54, %s4964_s5 }
 0x6d7   :  { %v596_v62 = vpop.permute.xlu0 %595 }
 0x6d8   :  { %vm597_vm7 = vcmp.eq.s32.totalorder %v596_v62, 1 }
 0x73f   :  { %v583_v57 = vpop.permute.xlu1 %582 }
 0x740   :  { %v585_v59 = vadd.f32 %v583_v57, %v575_v56 }
 0x742   :  { %4488 = vtanh.f32 %v585_v59 }
 0x74f   :  { %v4489_v60 = vpop.eup %4488 }
 0x750   :  { %588 = vrot.lane.b32.xlu1 %v4489_v60, %s4963_s20 }
 0x7c2   :  { %v589_v33 = vpop.permute.xlu1 %588 }
 0x7c3   :  { %v591_v36 = vmul.f32 %v4487_v52, %v589_v33  ;;  %v599_v52 = vsel %vm597_vm7, %v585_v59, %v489_v55  ;;  %v711_v55 = vld [vmem:[#allocation2 + $0x8] sm:$0x3] }
 0x7c5   :  { %v598_v45 = vsel %vm597_vm7, %v591_v36, %v488_v39 }
 0x7c6   :  { %603 = vrot.lane.b32.xlu1 %v598_v45, %s4964_s5 }
 0x838   :  { %v604_v32 = vpop.permute.xlu1 %603 }
 0x839   :  { %4392 = vmatmul.mubr.msk.f32.vlgmr.msra.gmra.mxu0 %vm184_vm0, %v604_v32 }
 0x83a   :  { %4406 = vmatpush3.msra.mxu0 %v5235_v37  ;;  %4413 = vmatprep.mubr.msk.f32.mxu0 %vm4961_vm1, %v4960_v35 }
 0x83b   :  { %4407 = vmatprep.subr.mxu0 %v4960_v35 }
 0x83c   :  { %4408 = vmatpush3.msra.mxu0 %v5240_v38 }
 0x83d   :  { %4409 = vmatprep.subr.mxu0 %v4960_v35 }
 0x83e   :  { %4410 = vmatpush3.msra.mxu0 %v5250_v40 }
 0x83f   :  { %4411 = vmatprep.subr.mxu0 %v4960_v35 }
 0x840   :  { %4412 = vmatpush3.msra.mxu0 %v5260_v42 }
 0x841   :  { %4427 = vmatprep.subr.mxu0 %v4960_v35 }
 0x8f9   :  { %v673_v61 = vpop.f32.mrf.mxu0 }
 0x8fa   :  { %v677_v63 = vadd.f32 %v673_v61, %v601_v58 }
 0x8fb   :  { %v4393_v39 = vpop.f32.mrf.mxu0 }
 0x8fc   :  { %4490 = vtanh.f32 %v677_v63  ;;  %v3906_v46 = vmul.f32 -1.442695, %v677_v63  ;;  %v813_v63 = vsel %vm812_vm10, 1, %v4962_v44 }
 0x8fe   :  { %4492 = vpow2.f32 %v3906_v46 }
 0x909   :  { %v4491_v34 = vpop.eup %4490 }
 0x90a   :  { %687 = vrot.lane.b32.xlu0 %v4491_v34, %s4963_s20 }
 0x90b   :  { %v4493_v47 = vpop.eup %4492 }
 0x90c   :  { %v681_v48 = vadd.f32 1.0, %v4493_v47 }
 0x90e   :  { %705 = vperm.xlu0 %4465, %v703_v41   ;;  %4494 = vrcp.f32 %v681_v48 }
 0x91b   :  { %v4495_v49 = vpop.eup %4494 }
 0x91c   :  { %v685_v53 = vmul.f32 %v4495_v49, %v599_v52 }
 0x97c   :  { %v688_v50 = vpop.permute.xlu0 %687 }
 0x97d   :  { %v690_v51 = vmul.f32 %v4495_v49, %v688_v50 }
 0x97f   :  { %692 = vrot.lane.b32.xlu1 %v690_v51, %s4964_s5 }
 0x989   :  { %v706_v60 = vpop.permute.xlu0 %705 }
 0x98a   :  { %vm707_vm9 = vcmp.eq.s32.totalorder %v706_v60, 1 }
 0x9f1   :  { %v693_v54 = vpop.permute.xlu1 %692 }
 0x9f2   :  { %v695_v56 = vadd.f32 %v693_v54, %v685_v53 }
 0x9f4   :  { %4496 = vtanh.f32 %v695_v56 }
 0xa01   :  { %v4497_v57 = vpop.eup %4496 }
 0xa02   :  { %698 = vrot.lane.b32.xlu1 %v4497_v57, %s4963_s20 }
 0xa74   :  { %v699_v33 = vpop.permute.xlu1 %698 }
 0xa75   :  { %v701_v36 = vmul.f32 %v4495_v49, %v699_v33  ;;  %v709_v49 = vsel %vm707_vm9, %v695_v56, %v599_v52  ;;  %v821_v52 = vld [vmem:[#allocation2 + $0xa] sm:$0x3] }
 0xa77   :  { %v708_v32 = vsel %vm707_vm9, %v701_v36, %v598_v45 }
 0xa78   :  { %713 = vrot.lane.b32.xlu0 %v708_v32, %s4964_s5 }
 0xaea   :  { %v714_v58 = vpop.permute.xlu0 %713 }
 0xaeb   :  { %4403 = vmatmul.mubr.msk.f32.vlgmr.msra.gmra.mxu1 %vm184_vm0, %v714_v58 }
 0xaec   :  { %4417 = vmatpush3.msra.mxu1 %v5235_v37  ;;  %4424 = vmatprep.mubr.msk.f32.mxu1 %vm4961_vm1, %v4960_v35 }
 0xaed   :  { %4418 = vmatprep.subr.mxu1 %v4960_v35 }
 0xaee   :  { %4419 = vmatpush3.msra.mxu1 %v5240_v38 }
 0xaef   :  { %4420 = vmatprep.subr.mxu1 %v4960_v35 }
 0xaf0   :  { %4421 = vmatpush3.msra.mxu1 %v5250_v40 }
 0xaf1   :  { %4422 = vmatprep.subr.mxu1 %v4960_v35 }
 0xaf2   :  { %4423 = vmatpush3.msra.mxu1 %v5260_v42 }
 0xbab   :  { %v783_v59 = vpop.f32.mrf.mxu1 }
 0xbac   :  { %v787_v62 = vadd.f32 %v783_v59, %v711_v55 }
 0xbad   :  { %v4404_v45 = vpop.f32.mrf.mxu1 }
 0xbae   :  { %4498 = vtanh.f32 %v787_v62  ;;  %v3908_v39 = vmul.f32 -1.442695, %v787_v62 }
 0xbb0   :  { %4500 = vpow2.f32 %v3908_v39 }
 0xbbb   :  { %v4499_v61 = vpop.eup %4498 }
 0xbbc   :  { %797 = vrot.lane.b32.xlu1 %v4499_v61, %s4963_s20 }
 0xbbd   :  { %v4501_v34 = vpop.eup %4500 }
 0xbbe   :  { %v791_v41 = vadd.f32 1.0, %v4501_v34 }
 0xbc0   :  { %815 = vperm.xlu1 %4464, %v813_v63   ;;  %4502 = vrcp.f32 %v791_v41 }
 0xbcd   :  { %v4503_v46 = vpop.eup %4502 }
 0xbce   :  { %v795_v50 = vmul.f32 %v4503_v46, %v709_v49 }
 0xc2e   :  { %v798_v47 = vpop.permute.xlu1 %797 }
 0xc2f   :  { %v800_v48 = vmul.f32 %v4503_v46, %v798_v47 }
 0xc31   :  { %802 = vrot.lane.b32.xlu0 %v800_v48, %s4964_s5 }
 0xc3b   :  { %v816_v57 = vpop.permute.xlu1 %815 }
 0xc3c   :  { %vm817_vm11 = vcmp.eq.s32.totalorder %v816_v57, 1  ;;  %v931_v57 = vld [vmem:[#allocation2 + $0xc] sm:$0x3] }
 0xca3   :  { %v803_v51 = vpop.permute.xlu0 %802 }
 0xca4   :  { %v805_v53 = vadd.f32 %v803_v51, %v795_v50 }
 0xca6   :  { %4504 = vtanh.f32 %v805_v53  ;;  %v819_v63 = vsel %vm817_vm11, %v805_v53, %v709_v49 }
 0xcb3   :  { %v4505_v54 = vpop.eup %4504 }
 0xcb4   :  { %808 = vrot.lane.b32.xlu0 %v4505_v54, %s4963_s20 }
 0xd26   :  { %v809_v33 = vpop.permute.xlu0 %808 }
 0xd27   :  { %v811_v36 = vmul.f32 %v4503_v46, %v809_v33 }
 0xd29   :  { %v818_v58 = vsel %vm817_vm11, %v811_v36, %v708_v32 }
 0xd2a   :  { %823 = vrot.lane.b32.xlu1 %v818_v58, %s4964_s5 }
 0xd9c   :  { %v824_v55 = vpop.permute.xlu1 %823 }
 0xd9d   :  { %4414 = vmatmul.mubr.msk.f32.vlgmr.msra.gmra.mxu0 %vm184_vm0, %v824_v55  ;;  %v1033_v55 = vsel %vm1032_vm14, 1, %v4962_v44 }
 0xd9e   :  { %4428 = vmatpush3.msra.mxu0 %v5235_v37  ;;  %4435 = vmatprep.mubr.msk.f32.mxu0 %vm4961_vm1, %v4960_v35 }
 0xd9f   :  { %4429 = vmatprep.subr.mxu0 %v4960_v35 }
 0xda0   :  { %4430 = vmatpush3.msra.mxu0 %v5240_v38  ;;  %v923_v38 = vsel %vm922_vm12, 1, %v4962_v44 }
 0xda1   :  { %4431 = vmatprep.subr.mxu0 %v4960_v35 }
 0xda2   :  { %4432 = vmatpush3.msra.mxu0 %v5250_v40 }
 0xda3   :  { %4433 = vmatprep.subr.mxu0 %v4960_v35 }
 0xda4   :  { %4434 = vmatpush3.msra.mxu0 %v5260_v42 }
 0xe5d   :  { %v893_v56 = vpop.f32.mrf.mxu0 }
 0xe5e   :  { %v897_v60 = vadd.f32 %v893_v56, %v821_v52 }
 0xe5f   :  { %v4415_v32 = vpop.f32.mrf.mxu0 }
 0xe60   :  { %4506 = vtanh.f32 %v897_v60  ;;  %v3910_v59 = vmul.f32 -1.442695, %v897_v60 }
 0xe62   :  { %4508 = vpow2.f32 %v3910_v59 }
 0xe6d   :  { %v4507_v37 = vpop.eup %4506 }
 0xe6e   :  { %907 = vrot.lane.b32.xlu0 %v4507_v37, %s4963_s20 }
 0xe6f   :  { %v4509_v40 = vpop.eup %4508 }
 0xe70   :  { %v901_v62 = vadd.f32 1.0, %v4509_v40 }
 0xe72   :  { %925 = vperm.xlu0 %4465, %v923_v38   ;;  %4510 = vrcp.f32 %v901_v62 }
 0xe7f   :  { %v4511_v45 = vpop.eup %4510 }
 0xe80   :  { %v905_v39 = vmul.f32 %v4511_v45, %v819_v63 }
 0xee0   :  { %v908_v42 = vpop.permute.xlu0 %907 }
 0xee1   :  { %v910_v61 = vmul.f32 %v4511_v45, %v908_v42 }
 0xee3   :  { %912 = vrot.lane.b32.xlu1 %v910_v61, %s4964_s5 }
 0xeed   :  { %v926_v47 = vpop.permute.xlu0 %925 }
 0xeee   :  { %vm927_vm13 = vcmp.eq.s32.totalorder %v926_v47, 1  ;;  %v1041_v47 = vld [vmem:[#allocation2 + $0xe] sm:$0x3] }
 0xf55   :  { %v913_v34 = vpop.permute.xlu1 %912 }
 0xf56   :  { %v915_v41 = vadd.f32 %v913_v34, %v905_v39 }
 0xf58   :  { %4512 = vtanh.f32 %v915_v41  ;;  %v929_v38 = vsel %vm927_vm13, %v915_v41, %v819_v63 }
 0xf65   :  { %v4513_v46 = vpop.eup %4512 }
 0xf66   :  { %918 = vrot.lane.b32.xlu1 %v4513_v46, %s4963_s20 }
 0xfd8   :  { %v919_v48 = vpop.permute.xlu1 %918 }
 0xfd9   :  { %v921_v50 = vmul.f32 %v4511_v45, %v919_v48 }
 0xfdb   :  { %v928_v51 = vsel %vm927_vm13, %v921_v50, %v818_v58 }
 0xfdc   :  { %933 = vrot.lane.b32.xlu0 %v928_v51, %s4964_s5 }
0x104e   :  { %v934_v54 = vpop.permute.xlu0 %933 }
0x104f   :  { %4425 = vmatmul.mubr.msk.f32.vlgmr.msra.gmra.mxu1 %vm184_vm0, %v934_v54  ;;  %v1143_v54 = vsel %vm1142_vm2, 1, %v4962_v44 }
0x110f   :  { %v1003_v49 = vpop.f32.mrf.mxu1 }
0x1110   :  { %v1007_v53 = vadd.f32 %v1003_v49, %v931_v57 }
0x1111   :  { %v4426_v33 = vpop.f32.mrf.mxu1 }
0x1112   :  { %4514 = vtanh.f32 %v1007_v53  ;;  %v3912_v52 = vmul.f32 -1.442695, %v1007_v53 }
0x1114   :  { %4516 = vpow2.f32 %v3912_v52 }
0x111f   :  { %v4515_v36 = vpop.eup %4514 }
0x1120   :  { %1017 = vrot.lane.b32.xlu1 %v4515_v36, %s4963_s20 }
0x1121   :  { %v4517_v58 = vpop.eup %4516 }
0x1122   :  { %v1011_v56 = vadd.f32 1.0, %v4517_v58 }
0x1124   :  { %1035 = vperm.xlu1 %4464, %v1033_v55   ;;  %4518 = vrcp.f32 %v1011_v56 }
0x1131   :  { %v4519_v60 = vpop.eup %4518 }
0x1132   :  { %v1015_v59 = vmul.f32 %v4519_v60, %v929_v38 }
0x1192   :  { %v1018_v32 = vpop.permute.xlu1 %1017 }
0x1193   :  { %v1020_v37 = vmul.f32 %v4519_v60, %v1018_v32 }
0x1195   :  { %1022 = vrot.lane.b32.xlu0 %v1020_v37, %s4964_s5 }
0x119f   :  { %v1036_v42 = vpop.permute.xlu1 %1035 }
0x11a0   :  { %vm1037_vm15 = vcmp.eq.s32.totalorder %v1036_v42, 1 }
0x1207   :  { %v1023_v40 = vpop.permute.xlu0 %1022 }
0x1208   :  { %v1025_v62 = vadd.f32 %v1023_v40, %v1015_v59 }
0x120a   :  { %4520 = vtanh.f32 %v1025_v62  ;;  %v1039_v55 = vsel %vm1037_vm15, %v1025_v62, %v929_v38 }
0x1217   :  { %v4521_v45 = vpop.eup %4520 }
0x1218   :  { %1028 = vrot.lane.b32.xlu0 %v4521_v45, %s4963_s20 }
0x128a   :  { %v1029_v61 = vpop.permute.xlu0 %1028 }
0x128b   :  { %v1031_v39 = vmul.f32 %v4519_v60, %v1029_v61 }
0x128d   :  { %v1038_v34 = vsel %vm1037_vm15, %v1031_v39, %v928_v51 }
0x128e   :  { %1043 = vrot.lane.b32.xlu1 %v1038_v34, %s4964_s5 }
0x1300   :  { %v1044_v46 = vpop.permute.xlu1 %1043 }
0x1301   :  { %4436 = vmatmul.mubr.msk.f32.vlgmr.msra.gmra.mxu0 %vm184_vm0, %v1044_v46 }
0x13c1   :  { %v1113_v63 = vpop.f32.mrf.mxu0 }
0x13c2   :  { %v1117_v41 = vadd.f32 %v1113_v63, %v1041_v47 }
0x13c3   :  { %v4437_v48 = vpop.f32.mrf.mxu0 }
0x13c4   :  { %4522 = vtanh.f32 %v1117_v41  ;;  %v3914_v57 = vmul.f32 -1.442695, %v1117_v41 }
0x13c6   :  { %4524 = vpow2.f32 %v3914_v57 }
0x13d1   :  { %v4523_v50 = vpop.eup %4522 }
0x13d2   :  { %1127 = vrot.lane.b32.xlu0 %v4523_v50, %s4963_s20 }
0x13d3   :  { %v4525_v51 = vpop.eup %4524 }
0x13d4   :  { %v1121_v49 = vadd.f32 1.0, %v4525_v51 }
0x13d6   :  { %1145 = vperm.xlu0 %4465, %v1143_v54   ;;  %4526 = vrcp.f32 %v1121_v49 }
0x13e3   :  { %v4527_v53 = vpop.eup %4526 }
0x13e4   :  { %v1125_v52 = vmul.f32 %v4527_v53, %v1039_v55 }
0x1444   :  { %v1128_v33 = vpop.permute.xlu0 %1127 }
0x1445   :  { %v1130_v36 = vmul.f32 %v4527_v53, %v1128_v33 }
0x1447   :  { %1132 = vrot.lane.b32.xlu1 %v1130_v36, %s4964_s5 }
0x14b9   :  { %v1133_v43 = vpop.permute.xlu1 %1132 }
0x14ba   :  { %v1135_v58 = vadd.f32 %v1133_v43, %v1125_v52 }
0x14bc   :  { %4528 = vtanh.f32 %v1135_v58 }
0x14bd   :  { %4933 = shalt.err (!%p4930_p4)  }
0x14be   :  { %170 = dma.hbm_to_vmem [thread:$0]  %s5861_s8, 32768, %s168_s22, [#allocation5 + $0x1]  ;;  %v1146_v60 = vpop.permute.xlu0 %1145  ;;  %v3940_v59 = vcombine.high %v5181_v24, %v5201_v28  ;;  %v3942_v40 = vcombine.high %v5186_v25, %v5206_v29  ;;  %v3939_v62 = vcombine.low %v5181_v24, %v5201_v28  ;;  %v3941_v45 = vcombine.low %v5186_v25, %v5206_v29 }
0x14bf   :  { %vm1147_vm3 = vcmp.eq.s32.totalorder %v1146_v60, 1 }
0x14c9   :  { %v4529_v56 = vpop.eup %4528 }
0x14ca   :  { %1138 = vrot.lane.b32.xlu1 %v4529_v56, %s4963_s20 }
0x153c   :  { %v1139_v32 = vpop.permute.xlu1 %1138 }
0x153d   :  { %v1141_v37 = vmul.f32 %v4527_v53, %v1139_v32 }
0x153f   :  { %v5420_v38 = vsel %vm1147_vm3, %v1141_v37, %v1038_v34 }
0x1540   :  { %4954 = dma.done.wait [#allocation5], 4096 }
0x1541   :  { %4955 = vsyncadd [#allocation5], 4294963200  ;;  %1425 = vmatprep.mubr.bf16.mxu1 %v4962_v44  ;;  %v3932_v42 = vcombine.high %v5141_v16, %v5161_v20  ;;  %v3934_v61 = vcombine.high %v5146_v17, %v5166_v21  ;;  %1466 = vmatprep.mubr.bf16.mxu0 %v4962_v44  ;;  %v3931_v24 = vcombine.low %v5141_v16, %v5161_v20  ;;  %v1153_v20 = vld [vmem:[%s5855_s2] sm:$0x3]  ;;  %vm1389_vm4 = vcmask 523264  }
0x1542   :  { %1401 = vmatprep.subr.bf16.mxu1 %v3940_v59  ;;  %1442 = vmatprep.subr.bf16.mxu0 %v3942_v40  ;;  %v3933_v25 = vcombine.low %v5146_v17, %v5166_v21  ;;  %v3924_v28 = vcombine.high %v5101_v8, %v5121_v12  ;;  %v3926_v29 = vcombine.high %v5106_v9, %v5126_v13 }
0x1543   :  { %1402 = vmatpush1.bf16.msra.mxu1 %v3939_v62  ;;  %1443 = vmatpush1.bf16.msra.mxu0 %v3941_v45  ;;  %v3923_v39 = vcombine.low %v5101_v8, %v5121_v12  ;;  %v3925_v34 = vcombine.low %v5106_v9, %v5126_v13  ;;  %v3916_v16 = vcombine.high %v5061_v0, %v5081_v4 }
0x1544   :  { %1403 = vmatprep.subr.bf16.mxu1 %v3932_v42  ;;  %1444 = vmatprep.subr.bf16.mxu0 %v3934_v61  ;;  %v3918_v17 = vcombine.high %v5066_v1, %v5086_v5  ;;  %v3915_v8 = vcombine.low %v5061_v0, %v5081_v4  ;;  %v3917_v9 = vcombine.low %v5066_v1, %v5086_v5 }
0x1545   :  { %v3944_v12 = vcombine.high %v5191_v26, %v5211_v30  ;;  %v3946_v13 = vcombine.high %v5196_v27, %v5216_v31  ;;  %v1154_v21 = vpack.c.bf16 %v1153_v20, %v1153_v20  ;;  %v3943_v46 = vcombine.low %v5191_v26, %v5211_v30 }
0x1546   :  { %v3945_v0 = vcombine.low %v5196_v27, %v5216_v31  ;;  %v3936_v1 = vcombine.high %v5151_v18, %v5171_v22  ;;  %v3938_v4 = vcombine.high %v5156_v19, %v5176_v23  ;;  %v3935_v5 = vcombine.low %v5151_v18, %v5171_v22 }
0x1547   :  { %1404 = vmatpush1.bf16.msra.mxu1 %v3931_v24  ;;  %1445 = vmatpush1.bf16.msra.mxu0 %v3933_v25  ;;  %v3937_v26 = vcombine.low %v5156_v19, %v5176_v23  ;;  %v3928_v27 = vcombine.high %v5111_v10, %v5131_v14  ;;  %v3930_v30 = vcombine.high %v5116_v11, %v5136_v15 }
0x1548   :  { %1405 = vmatprep.subr.bf16.mxu1 %v3924_v28  ;;  %1446 = vmatprep.subr.bf16.mxu0 %v3926_v29  ;;  %v3927_v18 = vcombine.low %v5111_v10, %v5131_v14  ;;  %v3929_v19 = vcombine.low %v5116_v11, %v5136_v15  ;;  %v3920_v22 = vcombine.high %v5071_v2, %v5091_v6  ;;  %v1189_v10 = vlaneseq }
0x1549   :  { %v3922_v23 = vcombine.high %v5076_v3, %v5096_v7  ;;  %v3919_v31 = vcombine.low %v5071_v2, %v5091_v6  ;;  %v1187_v2 = vld [vmem:[%s5860_s7] sm:$0xff] }
0x154a   :  { %v5497_v11 = vshrl.u32 %v1189_v10, 7 }
0x154b   :  { %1406 = vmatpush1.bf16.msra.mxu1 %v3923_v39  ;;  %1447 = vmatpush1.bf16.msra.mxu0 %v3925_v34 }
0x154c   :  { %1407 = vmatprep.subr.bf16.mxu1 %v3916_v16  ;;  %1448 = vmatprep.subr.bf16.mxu0 %v3918_v17  ;;  %v1191_v14 = vsub.s32 0, %v5497_v11  ;;  %v1199_v15 = vsub.s32 2, %v5497_v11  ;;  %v1203_v6 = vsub.s32 3, %v5497_v11  ;;  %v1207_v37 = vsub.s32 4, %v5497_v11 }
0x154d   :  { %v1215_v59 = vsub.s32 6, %v5497_v11  ;;  %v1211_v40 = vsub.s32 5, %v5497_v11  ;;  %v1219_v62 = vsub.s32 7, %v5497_v11 }
0x154e   :  { %v1200_v47 = vrot.slane %v1187_v2, %v1199_v15  ;;  %v1204_v41 = vrot.slane %v1187_v2, %v1203_v6  ;;  %v1208_v45 = vrot.slane %v1187_v2, %v1207_v37 }
0x154f   :  { %1408 = vmatpush1.bf16.msra.mxu1 %v3915_v8  ;;  %1449 = vmatpush1.bf16.msra.mxu0 %v3917_v9  ;;  %v1216_v42 = vrot.slane %v1187_v2, %v1215_v59  ;;  %v1212_v61 = vrot.slane %v1187_v2, %v1211_v40  ;;  %v1220_v24 = vrot.slane %v1187_v2, %v1219_v62 }
0x1550   :  { %1483 = vmatprep.subr.bf16.mxu1 %v3944_v12  ;;  %1524 = vmatprep.subr.bf16.mxu0 %v3946_v13 }
0x1552   :  { %3947 = vmatmul.mubr.msk.bf16.vlgmr.msra.gmra.mxu1 %vm1389_vm4, %v1154_v21  ;;  %3948 = vmatmul.mubr.msk.bf16.vlgmr.msra.gmra.mxu0 %vm1389_vm4, %v1154_v21 }
0x1553   :  { %1484 = vmatpush1.bf16.msra.mxu1 %v3943_v46  ;;  %1525 = vmatpush1.bf16.msra.mxu0 %v3945_v0 }
0x1554   :  { %1485 = vmatprep.subr.bf16.mxu1 %v3936_v1  ;;  %1526 = vmatprep.subr.bf16.mxu0 %v3938_v4 }
0x1555   :  { %1507 = vmatprep.mubr.bf16.mxu1 %v4962_v44  ;;  %1548 = vmatprep.mubr.bf16.mxu0 %v4962_v44  ;;  %v3921_v44 = vcombine.low %v5076_v3, %v5096_v7  ;;  %v1195_v3 = vsub.s32 1, %v5497_v11  ;;  %v1192_v7 = vrot.slane %v1187_v2, %v1191_v14 }
0x1557   :  { %1486 = vmatpush1.bf16.msra.mxu1 %v3935_v5  ;;  %1527 = vmatpush1.bf16.msra.mxu0 %v3937_v26  ;;  %v1196_v63 = vrot.slane %v1187_v2, %v1195_v3 }
0x1558   :  { %1487 = vmatprep.subr.bf16.mxu1 %v3928_v27  ;;  %1528 = vmatprep.subr.bf16.mxu0 %v3930_v30 }
0x155b   :  { %1488 = vmatpush1.bf16.msra.mxu1 %v3927_v18  ;;  %1529 = vmatpush1.bf16.msra.mxu0 %v3929_v19 }
0x155c   :  { %1489 = vmatprep.subr.bf16.mxu1 %v3920_v22  ;;  %1530 = vmatprep.subr.bf16.mxu0 %v3922_v23 }
0x155f   :  { %1490 = vmatpush1.bf16.msra.mxu1 %v3919_v31  ;;  %1531 = vmatpush1.bf16.msra.mxu0 %v3921_v44 }
0x1562   :  { %3949 = vmatmul.mubr.msk.bf16.vlgmr.msra.gmra.mxu1 %vm1389_vm4, %v1154_v21  ;;  %3950 = vmatmul.mubr.msk.bf16.vlgmr.msra.gmra.mxu0 %vm1389_vm4, %v1154_v21 }
0x1612   :  { %v1427_v48 = vpop.f32.mrf.mxu1  ;;  %v1468_v50 = vpop.f32.mrf.mxu0 }
0x1613   :  { %v5514_v54 = vadd.f32 %v1427_v48, %v1192_v7  ;;  %v5516_v57 = vadd.f32 %v1468_v50, %v1200_v47 }
0x1614   :  { %v1429_v51 = vpop.f32.mrf.mxu1  ;;  %v1470_v49 = vpop.f32.mrf.mxu0 }
0x1615   :  { %v1557_v53 = vmax.f32 %v5514_v54, 0.0  ;;  %v1559_v33 = vmax.f32 %v5516_v57, 0.0  ;;  %v1430_v36 = vadd.f32 %v1429_v51, %v1196_v63  ;;  %v1471_v55 = vadd.f32 %v1470_v49, %v1204_v41 }
0x1616   :  { %v1431_v52 = vpop.f32.mrf.mxu1  ;;  %v1472_v43 = vpop.f32.mrf.mxu0 }
0x1617   :  { %v1558_v58 = vmax.f32 %v1430_v36, 0.0  ;;  %v1560_v56 = vmax.f32 %v1471_v55, 0.0 }
0x1618   :  { %v1432_v60 = vpop.f32.mrf.mxu1  ;;  %v1473_v32 = vpop.f32.mrf.mxu0 }
0x1622   :  { %v1509_v25 = vpop.f32.mrf.mxu1  ;;  %v1550_v28 = vpop.f32.mrf.mxu0 }
0x1623   :  { %v5524_v29 = vadd.f32 %v1509_v25, %v1208_v45  ;;  %v5526_v39 = vadd.f32 %v1550_v28, %v1216_v42 }
0x1624   :  { %v1511_v34 = vpop.f32.mrf.mxu1  ;;  %v1552_v16 = vpop.f32.mrf.mxu0 }
0x1625   :  { %v1561_v17 = vmax.f32 %v5524_v29, 0.0  ;;  %v1563_v20 = vmax.f32 %v5526_v39, 0.0  ;;  %v5530_v8 = vadd.f32 %v1511_v34, %v1212_v61  ;;  %v5532_v9 = vadd.f32 %v1552_v16, %v1220_v24 }
0x1626   :  { %v1513_v12 = vpop.f32.mrf.mxu1  ;;  %v1554_v13 = vpop.f32.mrf.mxu0 }
0x1627   :  { %v1562_v21 = vmax.f32 %v5530_v8, 0.0  ;;  %v1564_v46 = vmax.f32 %v5532_v9, 0.0 }
0x1628   :  { %v1514_v0 = vpop.f32.mrf.mxu1  ;;  %v1555_v1 = vpop.f32.mrf.mxu0 }
0x1629   :  { %4956 = dma.done.wait [#allocation5 + $0x1], 32768 }
0x162a   :  { %4957 = vsyncadd [#allocation5 + $0x1], 4294934528  ;;  %v5536_v4 = vpack.c.bf16 %v1558_v58, %v1558_v58  ;;  %v5538_v5 = vpack.c.bf16 %v1560_v56, %v1560_v56  ;;  %3703 = vrot.lane.b32.xlu0 %v5420_v38, %s4964_s5  ;;  %v4530_v26 = vld [vmem:[#allocation4 + $0xe4] ss:$16 sps:$4 sm:$0xff]   ;;  %v4534_v30 = vld [vmem:[#allocation4 + $0xe0] ss:$16 sps:$4 sm:$0xff]   ;;  %v5557_v54 = vpack.c.bf16 %v1562_v21, %v1562_v21  ;;  %v5562_v57 = vpack.c.bf16 %v1564_v46, %v1564_v46 }
0x162b   :  { %v4532_v27 = vld [vmem:[#allocation4 + $0x2e4] ss:$16 sps:$4 sm:$0xff]   ;;  %3135 = vmatprep.subr.bf16.mxu1 %v4530_v26  ;;  %v4535_v18 = vld [vmem:[#allocation4 + $0x2e0] ss:$16 sps:$4 sm:$0xff]   ;;  %v4728_v29 = vld [vmem:[#allocation4 + $0xc8] ss:$16 sps:$4 sm:$0xff]  }
0x162c   :  { %3167 = vmatprep.mubr.bf16.mxu1 %v5536_v4  ;;  %3208 = vmatprep.mubr.bf16.mxu0 %v5538_v5  ;;  %v4536_v19 = vld [vmem:[#allocation4 + $0xc4] ss:$16 sps:$4 sm:$0xff]   ;;  %v4540_v23 = vld [vmem:[#allocation4 + $0xc0] ss:$16 sps:$4 sm:$0xff]   ;;  %v4736_v39 = vld [vmem:[#allocation4 + $0xac] ss:$16 sps:$4 sm:$0xff]  }
0x162d   :  { %3176 = vmatprep.subr.bf16.mxu0 %v4532_v27  ;;  %3136 = vmatpush1.bf16.msra.mxu1 %v4534_v30  ;;  %v4538_v22 = vld [vmem:[#allocation4 + $0x2c4] ss:$16 sps:$4 sm:$0xff]   ;;  %v4541_v31 = vld [vmem:[#allocation4 + $0x2c0] ss:$16 sps:$4 sm:$0xff]   ;;  %s4966_s19 = smov 112   ;;  %s4967_s21 = smov [#allocation6]  }
0x162e   :  { %3177 = vmatpush1.bf16.msra.mxu0 %v4535_v18  ;;  %3137 = vmatprep.subr.bf16.mxu1 %v4536_v19  ;;  %v4542_v44 = vld [vmem:[#allocation4 + $0xa4] ss:$16 sps:$4 sm:$0xff]   ;;  %v4546_v10 = vld [vmem:[#allocation4 + $0xa0] ss:$16 sps:$4 sm:$0xff]   ;;  %s3868_s22 = sshll.u32 %s4967_s21, 4  ;;  %s3869_s22 = int_to_ptr.vmem [resolvable:$true] %s3868_s22 }
0x162f   :  { %3178 = vmatprep.subr.bf16.mxu0 %v4538_v22  ;;  %v4544_v38 = vld [vmem:[#allocation4 + $0x2a4] ss:$16 sps:$4 sm:$0xff]   ;;  %v4547_v2 = vld [vmem:[#allocation4 + $0x2a0] ss:$16 sps:$4 sm:$0xff]   ;;  %p4939_p6 = scmp.lt.s32.totalorder %s3869_s22, %s3869_s22 }
0x1630   :  { %v4548_v7 = vld [vmem:[#allocation4 + $0x84] ss:$16 sps:$4 sm:$0xff]   ;;  %v4552_v63 = vld [vmem:[#allocation4 + $0x80] ss:$16 sps:$4 sm:$0xff]  }
0x1631   :  { %3138 = vmatpush1.bf16.msra.mxu1 %v4540_v23  ;;  %v4550_v47 = vld [vmem:[#allocation4 + $0x284] ss:$16 sps:$4 sm:$0xff]   ;;  %v4553_v41 = vld [vmem:[#allocation4 + $0x280] ss:$16 sps:$4 sm:$0xff]  }
0x1632   :  { %3179 = vmatpush1.bf16.msra.mxu0 %v4541_v31  ;;  %3139 = vmatprep.subr.bf16.mxu1 %v4542_v44  ;;  %v4554_v48 = vld [vmem:[#allocation4 + $0x64] ss:$16 sps:$4 sm:$0xff]   ;;  %v4558_v51 = vld [vmem:[#allocation4 + $0x60] ss:$16 sps:$4 sm:$0xff]  }
0x1633   :  { %3180 = vmatprep.subr.bf16.mxu0 %v4544_v38  ;;  %v4556_v50 = vld [vmem:[#allocation4 + $0x264] ss:$16 sps:$4 sm:$0xff]   ;;  %v4559_v49 = vld [vmem:[#allocation4 + $0x260] ss:$16 sps:$4 sm:$0xff]  }
0x1634   :  { %v4560_v36 = vld [vmem:[#allocation4 + $0x44] ss:$16 sps:$4 sm:$0xff]   ;;  %v4564_v52 = vld [vmem:[#allocation4 + $0x40] ss:$16 sps:$4 sm:$0xff]  }
0x1635   :  { %3140 = vmatpush1.bf16.msra.mxu1 %v4546_v10  ;;  %v4562_v55 = vld [vmem:[#allocation4 + $0x244] ss:$16 sps:$4 sm:$0xff]   ;;  %v4565_v43 = vld [vmem:[#allocation4 + $0x240] ss:$16 sps:$4 sm:$0xff]  }
0x1636   :  { %3181 = vmatpush1.bf16.msra.mxu0 %v4547_v2  ;;  %3141 = vmatprep.subr.bf16.mxu1 %v4548_v7  ;;  %v4566_v58 = vld [vmem:[#allocation4 + $0x24] ss:$16 sps:$4 sm:$0xff]   ;;  %v4570_v60 = vld [vmem:[#allocation4 + $0x20] ss:$16 sps:$4 sm:$0xff]  }
0x1637   :  { %3182 = vmatprep.subr.bf16.mxu0 %v4550_v47  ;;  %v4568_v56 = vld [vmem:[#allocation4 + $0x224] ss:$16 sps:$4 sm:$0xff]   ;;  %v4571_v32 = vld [vmem:[#allocation4 + $0x220] ss:$16 sps:$4 sm:$0xff]  }
0x1638   :  { %v4572_v37 = vld [vmem:[#allocation4 + $0x4] ss:$16 sps:$4 sm:$0xff]   ;;  %v4576_v40 = vld [vmem:[#allocation4] ss:$16 sps:$4 sm:$0xff]  }
0x1639   :  { %3142 = vmatpush1.bf16.msra.mxu1 %v4552_v63  ;;  %v4574_v59 = vld [vmem:[#allocation4 + $0x204] ss:$16 sps:$4 sm:$0xff]   ;;  %v4577_v62 = vld [vmem:[#allocation4 + $0x200] ss:$16 sps:$4 sm:$0xff]  }
0x163a   :  { %3183 = vmatpush1.bf16.msra.mxu0 %v4553_v41  ;;  %3143 = vmatprep.subr.bf16.mxu1 %v4554_v48  ;;  %v4578_v45 = vld [vmem:[#allocation4 + $0x1e4] ss:$16 sps:$4 sm:$0xff]   ;;  %v4582_v61 = vld [vmem:[#allocation4 + $0x1e0] ss:$16 sps:$4 sm:$0xff]  }
0x163b   :  { %3184 = vmatprep.subr.bf16.mxu0 %v4556_v50  ;;  %v4580_v42 = vld [vmem:[#allocation4 + $0x3e4] ss:$16 sps:$4 sm:$0xff]   ;;  %v4583_v24 = vld [vmem:[#allocation4 + $0x3e0] ss:$16 sps:$4 sm:$0xff]  }
0x163c   :  { %v4584_v25 = vld [vmem:[#allocation4 + $0x1c4] ss:$16 sps:$4 sm:$0xff]   ;;  %v4588_v34 = vld [vmem:[#allocation4 + $0x1c0] ss:$16 sps:$4 sm:$0xff]  }
0x163d   :  { %3144 = vmatpush1.bf16.msra.mxu1 %v4558_v51  ;;  %v4586_v28 = vld [vmem:[#allocation4 + $0x3c4] ss:$16 sps:$4 sm:$0xff]   ;;  %v4589_v16 = vld [vmem:[#allocation4 + $0x3c0] ss:$16 sps:$4 sm:$0xff]  }
0x163e   :  { %3185 = vmatpush1.bf16.msra.mxu0 %v4559_v49  ;;  %3145 = vmatprep.subr.bf16.mxu1 %v4560_v36  ;;  %v4590_v12 = vld [vmem:[#allocation4 + $0x1a4] ss:$16 sps:$4 sm:$0xff]   ;;  %v4594_v0 = vld [vmem:[#allocation4 + $0x1a0] ss:$16 sps:$4 sm:$0xff]  }
0x163f   :  { %3186 = vmatprep.subr.bf16.mxu0 %v4562_v55  ;;  %v4592_v13 = vld [vmem:[#allocation4 + $0x3a4] ss:$16 sps:$4 sm:$0xff]   ;;  %v4595_v1 = vld [vmem:[#allocation4 + $0x3a0] ss:$16 sps:$4 sm:$0xff]  }
0x1640   :  { %v4596_v26 = vld [vmem:[#allocation4 + $0x184] ss:$16 sps:$4 sm:$0xff]   ;;  %v4600_v30 = vld [vmem:[#allocation4 + $0x180] ss:$16 sps:$4 sm:$0xff]  }
0x1641   :  { %3146 = vmatpush1.bf16.msra.mxu1 %v4564_v52  ;;  %v4598_v27 = vld [vmem:[#allocation4 + $0x384] ss:$16 sps:$4 sm:$0xff]   ;;  %v4601_v18 = vld [vmem:[#allocation4 + $0x380] ss:$16 sps:$4 sm:$0xff]   ;;  %v5547_v52 = vpack.c.bf16 %v1557_v53, %v1557_v53 }
0x1642   :  { %3187 = vmatpush1.bf16.msra.mxu0 %v4565_v43  ;;  %3147 = vmatprep.subr.bf16.mxu1 %v4566_v58  ;;  %v4602_v19 = vld [vmem:[#allocation4 + $0x164] ss:$16 sps:$4 sm:$0xff]   ;;  %v4606_v23 = vld [vmem:[#allocation4 + $0x160] ss:$16 sps:$4 sm:$0xff]   ;;  %v5552_v43 = vpack.c.bf16 %v1559_v33, %v1559_v33 }
0x1643   :  { %3188 = vmatprep.subr.bf16.mxu0 %v4568_v56  ;;  %v4604_v22 = vld [vmem:[#allocation4 + $0x364] ss:$16 sps:$4 sm:$0xff]   ;;  %v4607_v31 = vld [vmem:[#allocation4 + $0x360] ss:$16 sps:$4 sm:$0xff]  }
0x1644   :  { %v4608_v44 = vld [vmem:[#allocation4 + $0x144] ss:$16 sps:$4 sm:$0xff]   ;;  %v4612_v10 = vld [vmem:[#allocation4 + $0x140] ss:$16 sps:$4 sm:$0xff]  }
0x1645   :  { %3148 = vmatpush1.bf16.msra.mxu1 %v4570_v60  ;;  %v4610_v38 = vld [vmem:[#allocation4 + $0x344] ss:$16 sps:$4 sm:$0xff]   ;;  %v4613_v2 = vld [vmem:[#allocation4 + $0x340] ss:$16 sps:$4 sm:$0xff]  }
0x1646   :  { %3189 = vmatpush1.bf16.msra.mxu0 %v4571_v32  ;;  %3149 = vmatprep.subr.bf16.mxu1 %v4572_v37  ;;  %v4614_v7 = vld [vmem:[#allocation4 + $0x124] ss:$16 sps:$4 sm:$0xff]   ;;  %v4618_v63 = vld [vmem:[#allocation4 + $0x120] ss:$16 sps:$4 sm:$0xff]  }
0x1647   :  { %3190 = vmatprep.subr.bf16.mxu0 %v4574_v59  ;;  %v4616_v47 = vld [vmem:[#allocation4 + $0x324] ss:$16 sps:$4 sm:$0xff]   ;;  %v4619_v41 = vld [vmem:[#allocation4 + $0x320] ss:$16 sps:$4 sm:$0xff]  }
0x1648   :  { %v4620_v48 = vld [vmem:[#allocation4 + $0x104] ss:$16 sps:$4 sm:$0xff]   ;;  %v4624_v51 = vld [vmem:[#allocation4 + $0x100] ss:$16 sps:$4 sm:$0xff]  }
0x1649   :  { %3150 = vmatpush1.bf16.msra.mxu1 %v4576_v40  ;;  %v4622_v50 = vld [vmem:[#allocation4 + $0x304] ss:$16 sps:$4 sm:$0xff]   ;;  %v4625_v49 = vld [vmem:[#allocation4 + $0x300] ss:$16 sps:$4 sm:$0xff]  }
0x164a   :  { %3191 = vmatpush1.bf16.msra.mxu0 %v4577_v62  ;;  %3151 = vmatprep.subr.bf16.mxu1 %v4578_v45  ;;  %v4628_v36 = vld [vmem:[#allocation4 + $0x4e4] ss:$16 sps:$4 sm:$0xff]   ;;  %v4626_v58 = vld [vmem:[#allocation4 + $0x4e0] ss:$16 sps:$4 sm:$0xff]  }
0x164b   :  { %3192 = vmatprep.subr.bf16.mxu0 %v4580_v42  ;;  %v4631_v55 = vld [vmem:[#allocation4 + $0x6e4] ss:$16 sps:$4 sm:$0xff]   ;;  %v4629_v56 = vld [vmem:[#allocation4 + $0x6e0] ss:$16 sps:$4 sm:$0xff]  }
0x164c   :  { %v4634_v60 = vld [vmem:[#allocation4 + $0x4c4] ss:$16 sps:$4 sm:$0xff]   ;;  %v4632_v53 = vld [vmem:[#allocation4 + $0x4c0] ss:$16 sps:$4 sm:$0xff]  }
0x164d   :  { %3152 = vmatpush2.bf16.msra.mxu1 %v4582_v61  ;;  %v4637_v32 = vld [vmem:[#allocation4 + $0x6c4] ss:$16 sps:$4 sm:$0xff]   ;;  %v4635_v33 = vld [vmem:[#allocation4 + $0x6c0] ss:$16 sps:$4 sm:$0xff]  }
0x164e   :  { %3193 = vmatpush2.bf16.msra.mxu0 %v4583_v24  ;;  %3153 = vmatprep.subr.bf16.mxu1 %v4584_v25  ;;  %v4640_v37 = vld [vmem:[#allocation4 + $0x4a4] ss:$16 sps:$4 sm:$0xff]   ;;  %v4638_v9 = vld [vmem:[#allocation4 + $0x4a0] ss:$16 sps:$4 sm:$0xff]  }
0x164f   :  { %3194 = vmatprep.subr.bf16.mxu0 %v4586_v28  ;;  %v4643_v8 = vld [vmem:[#allocation4 + $0x6a4] ss:$16 sps:$4 sm:$0xff]   ;;  %v4641_v21 = vld [vmem:[#allocation4 + $0x6a0] ss:$16 sps:$4 sm:$0xff]  }
0x1650   :  { %v4646_v46 = vld [vmem:[#allocation4 + $0x484] ss:$16 sps:$4 sm:$0xff]   ;;  %v4644_v40 = vld [vmem:[#allocation4 + $0x480] ss:$16 sps:$4 sm:$0xff]  }
0x1651   :  { %3154 = vmatpush2.bf16.msra.mxu1 %v4588_v34  ;;  %v4649_v59 = vld [vmem:[#allocation4 + $0x684] ss:$16 sps:$4 sm:$0xff]   ;;  %v4647_v62 = vld [vmem:[#allocation4 + $0x680] ss:$16 sps:$4 sm:$0xff]  }
0x1652   :  { %3195 = vmatpush2.bf16.msra.mxu0 %v4589_v16  ;;  %3155 = vmatprep.subr.bf16.mxu1 %v4590_v12  ;;  %v4652_v45 = vld [vmem:[#allocation4 + $0x464] ss:$16 sps:$4 sm:$0xff]   ;;  %v4650_v61 = vld [vmem:[#allocation4 + $0x460] ss:$16 sps:$4 sm:$0xff]  }
0x1653   :  { %3196 = vmatprep.subr.bf16.mxu0 %v4592_v13  ;;  %v4655_v42 = vld [vmem:[#allocation4 + $0x664] ss:$16 sps:$4 sm:$0xff]   ;;  %v4653_v24 = vld [vmem:[#allocation4 + $0x660] ss:$16 sps:$4 sm:$0xff]  }
0x1654   :  { %v4658_v25 = vld [vmem:[#allocation4 + $0x444] ss:$16 sps:$4 sm:$0xff]   ;;  %v4656_v34 = vld [vmem:[#allocation4 + $0x440] ss:$16 sps:$4 sm:$0xff]  }
0x1655   :  { %3156 = vmatpush2.bf16.msra.mxu1 %v4594_v0  ;;  %v4661_v28 = vld [vmem:[#allocation4 + $0x644] ss:$16 sps:$4 sm:$0xff]   ;;  %v4659_v16 = vld [vmem:[#allocation4 + $0x640] ss:$16 sps:$4 sm:$0xff]  }
0x1656   :  { %3197 = vmatpush2.bf16.msra.mxu0 %v4595_v1  ;;  %3157 = vmatprep.subr.bf16.mxu1 %v4596_v26  ;;  %v4664_v12 = vld [vmem:[#allocation4 + $0x424] ss:$16 sps:$4 sm:$0xff]   ;;  %v4662_v0 = vld [vmem:[#allocation4 + $0x420] ss:$16 sps:$4 sm:$0xff]  }
0x1657   :  { %3198 = vmatprep.subr.bf16.mxu0 %v4598_v27  ;;  %v4667_v13 = vld [vmem:[#allocation4 + $0x624] ss:$16 sps:$4 sm:$0xff]   ;;  %v4665_v1 = vld [vmem:[#allocation4 + $0x620] ss:$16 sps:$4 sm:$0xff]  }
0x1658   :  { %v4670_v26 = vld [vmem:[#allocation4 + $0x404] ss:$16 sps:$4 sm:$0xff]  }
0x1659   :  { %3158 = vmatpush2.bf16.msra.mxu1 %v4600_v30  ;;  %v4673_v27 = vld [vmem:[#allocation4 + $0x604] ss:$16 sps:$4 sm:$0xff]   ;;  %v4668_v30 = vld [vmem:[#allocation4 + $0x400] ss:$16 sps:$4 sm:$0xff]  }
0x165a   :  { %3199 = vmatpush2.bf16.msra.mxu0 %v4601_v18  ;;  %3159 = vmatprep.subr.bf16.mxu1 %v4602_v19  ;;  %v4671_v18 = vld [vmem:[#allocation4 + $0x600] ss:$16 sps:$4 sm:$0xff]   ;;  %v4676_v19 = vld [vmem:[#allocation4 + $0x5e4] ss:$16 sps:$4 sm:$0xff]  }
0x165b   :  { %3200 = vmatprep.subr.bf16.mxu0 %v4604_v22  ;;  %v4679_v22 = vld [vmem:[#allocation4 + $0x7e4] ss:$16 sps:$4 sm:$0xff]  }
0x165d   :  { %3160 = vmatpush2.bf16.msra.mxu1 %v4606_v23  ;;  %v4674_v23 = vld [vmem:[#allocation4 + $0x5e0] ss:$16 sps:$4 sm:$0xff]  }
0x165e   :  { %3201 = vmatpush2.bf16.msra.mxu0 %v4607_v31  ;;  %3161 = vmatprep.subr.bf16.mxu1 %v4608_v44  ;;  %v4677_v31 = vld [vmem:[#allocation4 + $0x7e0] ss:$16 sps:$4 sm:$0xff]   ;;  %v4682_v44 = vld [vmem:[#allocation4 + $0x5c4] ss:$16 sps:$4 sm:$0xff]  }
0x165f   :  { %3202 = vmatprep.subr.bf16.mxu0 %v4610_v38  ;;  %v4685_v38 = vld [vmem:[#allocation4 + $0x7c4] ss:$16 sps:$4 sm:$0xff]  }
0x1661   :  { %3162 = vmatpush2.bf16.msra.mxu1 %v4612_v10  ;;  %v4680_v10 = vld [vmem:[#allocation4 + $0x5c0] ss:$16 sps:$4 sm:$0xff]  }
0x1662   :  { %3203 = vmatpush2.bf16.msra.mxu0 %v4613_v2  ;;  %3163 = vmatprep.subr.bf16.mxu1 %v4614_v7  ;;  %v4683_v2 = vld [vmem:[#allocation4 + $0x7c0] ss:$16 sps:$4 sm:$0xff]   ;;  %v4688_v7 = vld [vmem:[#allocation4 + $0x5a4] ss:$16 sps:$4 sm:$0xff]  }
0x1663   :  { %3204 = vmatprep.subr.bf16.mxu0 %v4616_v47  ;;  %v4691_v47 = vld [vmem:[#allocation4 + $0x7a4] ss:$16 sps:$4 sm:$0xff]  }
0x1665   :  { %3164 = vmatpush2.bf16.msra.mxu1 %v4618_v63  ;;  %v4686_v63 = vld [vmem:[#allocation4 + $0x5a0] ss:$16 sps:$4 sm:$0xff]  }
0x1666   :  { %3205 = vmatpush2.bf16.msra.mxu0 %v4619_v41  ;;  %3165 = vmatprep.subr.bf16.mxu1 %v4620_v48  ;;  %v4689_v41 = vld [vmem:[#allocation4 + $0x7a0] ss:$16 sps:$4 sm:$0xff]   ;;  %v4694_v48 = vld [vmem:[#allocation4 + $0x584] ss:$16 sps:$4 sm:$0xff]  }
0x1667   :  { %3206 = vmatprep.subr.bf16.mxu0 %v4622_v50  ;;  %v4697_v50 = vld [vmem:[#allocation4 + $0x784] ss:$16 sps:$4 sm:$0xff]  }
0x1669   :  { %3166 = vmatpush2.bf16.msra.mxu1 %v4624_v51  ;;  %v4692_v51 = vld [vmem:[#allocation4 + $0x580] ss:$16 sps:$4 sm:$0xff]  }
0x166a   :  { %3207 = vmatpush2.bf16.msra.mxu0 %v4625_v49  ;;  %3217 = vmatprep.subr.bf16.mxu1 %v4628_v36  ;;  %v4695_v49 = vld [vmem:[#allocation4 + $0x780] ss:$16 sps:$4 sm:$0xff]   ;;  %v4700_v36 = vld [vmem:[#allocation4 + $0x564] ss:$16 sps:$4 sm:$0xff]  }
0x166b   :  { %3258 = vmatprep.subr.bf16.mxu0 %v4631_v55  ;;  %v4703_v55 = vld [vmem:[#allocation4 + $0x764] ss:$16 sps:$4 sm:$0xff]  }
0x166c   :  { %3168 = vmatmul.mubr.bf16.vlgmr.msra.gmra.mxu1 %v5547_v52 }
0x166d   :  { %3209 = vmatmul.mubr.bf16.vlgmr.msra.gmra.mxu0 %v5552_v43  ;;  %3218 = vmatpush1.bf16.msra.mxu1 %v4626_v58  ;;  %v4698_v58 = vld [vmem:[#allocation4 + $0x560] ss:$16 sps:$4 sm:$0xff]  }
0x166e   :  { %3259 = vmatpush1.bf16.msra.mxu0 %v4629_v56  ;;  %3219 = vmatprep.subr.bf16.mxu1 %v4634_v60  ;;  %v4701_v56 = vld [vmem:[#allocation4 + $0x760] ss:$16 sps:$4 sm:$0xff]   ;;  %v4706_v60 = vld [vmem:[#allocation4 + $0x544] ss:$16 sps:$4 sm:$0xff]  }
0x166f   :  { %3260 = vmatprep.subr.bf16.mxu0 %v4637_v32  ;;  %3249 = vmatprep.mubr.bf16.mxu1 %v5557_v54  ;;  %v4709_v32 = vld [vmem:[#allocation4 + $0x744] ss:$16 sps:$4 sm:$0xff]  }
0x1670   :  { %3290 = vmatprep.mubr.bf16.mxu0 %v5562_v57 }
0x1671   :  { %3220 = vmatpush1.bf16.msra.mxu1 %v4632_v53  ;;  %v4704_v53 = vld [vmem:[#allocation4 + $0x540] ss:$16 sps:$4 sm:$0xff]  }
0x1672   :  { %3261 = vmatpush1.bf16.msra.mxu0 %v4635_v33  ;;  %3221 = vmatprep.subr.bf16.mxu1 %v4640_v37  ;;  %v4707_v33 = vld [vmem:[#allocation4 + $0x740] ss:$16 sps:$4 sm:$0xff]   ;;  %v4712_v37 = vld [vmem:[#allocation4 + $0x524] ss:$16 sps:$4 sm:$0xff]  }
0x1673   :  { %3262 = vmatprep.subr.bf16.mxu0 %v4643_v8  ;;  %v4715_v8 = vld [vmem:[#allocation4 + $0x724] ss:$16 sps:$4 sm:$0xff]  }
0x1675   :  { %3222 = vmatpush1.bf16.msra.mxu1 %v4638_v9  ;;  %v4710_v9 = vld [vmem:[#allocation4 + $0x520] ss:$16 sps:$4 sm:$0xff]  }
0x1676   :  { %3263 = vmatpush1.bf16.msra.mxu0 %v4641_v21  ;;  %3223 = vmatprep.subr.bf16.mxu1 %v4646_v46  ;;  %v4713_v21 = vld [vmem:[#allocation4 + $0x720] ss:$16 sps:$4 sm:$0xff]   ;;  %v4718_v46 = vld [vmem:[#allocation4 + $0x504] ss:$16 sps:$4 sm:$0xff]  }
0x1677   :  { %3264 = vmatprep.subr.bf16.mxu0 %v4649_v59  ;;  %v4721_v59 = vld [vmem:[#allocation4 + $0x704] ss:$16 sps:$4 sm:$0xff]  }
0x1679   :  { %3224 = vmatpush1.bf16.msra.mxu1 %v4644_v40  ;;  %v4716_v40 = vld [vmem:[#allocation4 + $0x500] ss:$16 sps:$4 sm:$0xff]  }
0x167a   :  { %3265 = vmatpush1.bf16.msra.mxu0 %v4647_v62  ;;  %3225 = vmatprep.subr.bf16.mxu1 %v4652_v45  ;;  %v4719_v62 = vld [vmem:[#allocation4 + $0x700] ss:$16 sps:$4 sm:$0xff]   ;;  %v4724_v45 = vld [vmem:[#allocation4 + $0xec] ss:$16 sps:$4 sm:$0xff]  }
0x167b   :  { %3266 = vmatprep.subr.bf16.mxu0 %v4655_v42  ;;  %v4727_v42 = vld [vmem:[#allocation4 + $0x2ec] ss:$16 sps:$4 sm:$0xff]  }
0x167d   :  { %3226 = vmatpush1.bf16.msra.mxu1 %v4650_v61  ;;  %v5571_v61 = vpack.c.bf16 %v1561_v17, %v1561_v17  ;;  %v4731_v17 = vld [vmem:[#allocation4 + $0x2c8] ss:$16 sps:$4 sm:$0xff]  }
0x167e   :  { %3267 = vmatpush1.bf16.msra.mxu0 %v4653_v24  ;;  %3227 = vmatprep.subr.bf16.mxu1 %v4658_v25  ;;  %v5576_v24 = vpack.c.bf16 %v1563_v20, %v1563_v20  ;;  %v4722_v25 = vld [vmem:[#allocation4 + $0xe8] ss:$16 sps:$4 sm:$0xff]   ;;  %v4739_v20 = vld [vmem:[#allocation4 + $0x2ac] ss:$16 sps:$4 sm:$0xff]  }
0x167f   :  { %3268 = vmatprep.subr.bf16.mxu0 %v4661_v28  ;;  %v4725_v28 = vld [vmem:[#allocation4 + $0x2e8] ss:$16 sps:$4 sm:$0xff]  }
0x1681   :  { %3228 = vmatpush1.bf16.msra.mxu1 %v4656_v34  ;;  %v4730_v34 = vld [vmem:[#allocation4 + $0xcc] ss:$16 sps:$4 sm:$0xff]  }
0x1682   :  { %3269 = vmatpush1.bf16.msra.mxu0 %v4659_v16  ;;  %3229 = vmatprep.subr.bf16.mxu1 %v4664_v12  ;;  %v4733_v16 = vld [vmem:[#allocation4 + $0x2cc] ss:$16 sps:$4 sm:$0xff]   ;;  %v4734_v12 = vld [vmem:[#allocation4 + $0xa8] ss:$16 sps:$4 sm:$0xff]  }
0x1683   :  { %3270 = vmatprep.subr.bf16.mxu0 %v4667_v13  ;;  %v4737_v13 = vld [vmem:[#allocation4 + $0x2a8] ss:$16 sps:$4 sm:$0xff]  }
0x1685   :  { %3230 = vmatpush1.bf16.msra.mxu1 %v4662_v0  ;;  %v4742_v0 = vld [vmem:[#allocation4 + $0x8c] ss:$16 sps:$4 sm:$0xff]  }
0x1686   :  { %3271 = vmatpush1.bf16.msra.mxu0 %v4665_v1  ;;  %3231 = vmatprep.subr.bf16.mxu1 %v4670_v26  ;;  %v4745_v1 = vld [vmem:[#allocation4 + $0x28c] ss:$16 sps:$4 sm:$0xff]   ;;  %v4740_v26 = vld [vmem:[#allocation4 + $0x88] ss:$16 sps:$4 sm:$0xff]  }
0x1687   :  { %3272 = vmatprep.subr.bf16.mxu0 %v4673_v27  ;;  %v4743_v27 = vld [vmem:[#allocation4 + $0x288] ss:$16 sps:$4 sm:$0xff]  }
0x1689   :  { %3232 = vmatpush1.bf16.msra.mxu1 %v4668_v30  ;;  %v4748_v30 = vld [vmem:[#allocation4 + $0x6c] ss:$16 sps:$4 sm:$0xff]  }
0x168a   :  { %3273 = vmatpush1.bf16.msra.mxu0 %v4671_v18  ;;  %3233 = vmatprep.subr.bf16.mxu1 %v4676_v19  ;;  %v4751_v18 = vld [vmem:[#allocation4 + $0x26c] ss:$16 sps:$4 sm:$0xff]   ;;  %v4746_v19 = vld [vmem:[#allocation4 + $0x68] ss:$16 sps:$4 sm:$0xff]  }
0x168b   :  { %3274 = vmatprep.subr.bf16.mxu0 %v4679_v22  ;;  %v4757_v22 = vld [vmem:[#allocation4 + $0x24c] ss:$16 sps:$4 sm:$0xff]  }
0x168d   :  { %3234 = vmatpush2.bf16.msra.mxu1 %v4674_v23  ;;  %v4752_v23 = vld [vmem:[#allocation4 + $0x48] ss:$16 sps:$4 sm:$0xff]  }
0x168e   :  { %3275 = vmatpush2.bf16.msra.mxu0 %v4677_v31  ;;  %3235 = vmatprep.subr.bf16.mxu1 %v4682_v44  ;;  %v4755_v31 = vld [vmem:[#allocation4 + $0x248] ss:$16 sps:$4 sm:$0xff]   ;;  %v4760_v44 = vld [vmem:[#allocation4 + $0x2c] ss:$16 sps:$4 sm:$0xff]  }
0x168f   :  { %3276 = vmatprep.subr.bf16.mxu0 %v4685_v38  ;;  %v4763_v38 = vld [vmem:[#allocation4 + $0x22c] ss:$16 sps:$4 sm:$0xff]  }
0x1691   :  { %3236 = vmatpush2.bf16.msra.mxu1 %v4680_v10  ;;  %v4758_v10 = vld [vmem:[#allocation4 + $0x28] ss:$16 sps:$4 sm:$0xff]  }
0x1692   :  { %3277 = vmatpush2.bf16.msra.mxu0 %v4683_v2  ;;  %3237 = vmatprep.subr.bf16.mxu1 %v4688_v7  ;;  %v4761_v2 = vld [vmem:[#allocation4 + $0x228] ss:$16 sps:$4 sm:$0xff]   ;;  %v4766_v7 = vld [vmem:[#allocation4 + $0xc] ss:$16 sps:$4 sm:$0xff]  }
0x1693   :  { %3278 = vmatprep.subr.bf16.mxu0 %v4691_v47  ;;  %v4769_v47 = vld [vmem:[#allocation4 + $0x20c] ss:$16 sps:$4 sm:$0xff]  }
0x1695   :  { %3238 = vmatpush2.bf16.msra.mxu1 %v4686_v63  ;;  %v4764_v63 = vld [vmem:[#allocation4 + $0x8] ss:$16 sps:$4 sm:$0xff]  }
0x1696   :  { %3279 = vmatpush2.bf16.msra.mxu0 %v4689_v41  ;;  %3239 = vmatprep.subr.bf16.mxu1 %v4694_v48  ;;  %v4767_v41 = vld [vmem:[#allocation4 + $0x208] ss:$16 sps:$4 sm:$0xff]   ;;  %v4772_v48 = vld [vmem:[#allocation4 + $0x1ec] ss:$16 sps:$4 sm:$0xff]  }
0x1697   :  { %3280 = vmatprep.subr.bf16.mxu0 %v4697_v50  ;;  %v4775_v50 = vld [vmem:[#allocation4 + $0x3ec] ss:$16 sps:$4 sm:$0xff]  }
0x1699   :  { %3240 = vmatpush2.bf16.msra.mxu1 %v4692_v51  ;;  %v4770_v51 = vld [vmem:[#allocation4 + $0x1e8] ss:$16 sps:$4 sm:$0xff]  }
0x169a   :  { %3281 = vmatpush2.bf16.msra.mxu0 %v4695_v49  ;;  %3241 = vmatprep.subr.bf16.mxu1 %v4700_v36  ;;  %v4773_v49 = vld [vmem:[#allocation4 + $0x3e8] ss:$16 sps:$4 sm:$0xff]   ;;  %v4778_v36 = vld [vmem:[#allocation4 + $0x1cc] ss:$16 sps:$4 sm:$0xff]  }
0x169b   :  { %3282 = vmatprep.subr.bf16.mxu0 %v4703_v55  ;;  %v4781_v55 = vld [vmem:[#allocation4 + $0x3cc] ss:$16 sps:$4 sm:$0xff]  }
0x169d   :  { %3242 = vmatpush2.bf16.msra.mxu1 %v4698_v58  ;;  %v4776_v58 = vld [vmem:[#allocation4 + $0x1c8] ss:$16 sps:$4 sm:$0xff]  }
0x169e   :  { %3283 = vmatpush2.bf16.msra.mxu0 %v4701_v56  ;;  %3243 = vmatprep.subr.bf16.mxu1 %v4706_v60  ;;  %v4779_v56 = vld [vmem:[#allocation4 + $0x3c8] ss:$16 sps:$4 sm:$0xff]   ;;  %v4784_v60 = vld [vmem:[#allocation4 + $0x1ac] ss:$16 sps:$4 sm:$0xff]  }
0x169f   :  { %3284 = vmatprep.subr.bf16.mxu0 %v4709_v32  ;;  %v4787_v32 = vld [vmem:[#allocation4 + $0x3ac] ss:$16 sps:$4 sm:$0xff]  }
0x16a1   :  { %3244 = vmatpush2.bf16.msra.mxu1 %v4704_v53  ;;  %v4782_v53 = vld [vmem:[#allocation4 + $0x1a8] ss:$16 sps:$4 sm:$0xff]  }
0x16a2   :  { %3285 = vmatpush2.bf16.msra.mxu0 %v4707_v33  ;;  %3245 = vmatprep.subr.bf16.mxu1 %v4712_v37  ;;  %v4785_v33 = vld [vmem:[#allocation4 + $0x3a8] ss:$16 sps:$4 sm:$0xff]   ;;  %v4790_v37 = vld [vmem:[#allocation4 + $0x18c] ss:$16 sps:$4 sm:$0xff]  }
0x16a3   :  { %3286 = vmatprep.subr.bf16.mxu0 %v4715_v8  ;;  %v4793_v8 = vld [vmem:[#allocation4 + $0x38c] ss:$16 sps:$4 sm:$0xff]  }
0x16a5   :  { %3246 = vmatpush2.bf16.msra.mxu1 %v4710_v9  ;;  %v4788_v9 = vld [vmem:[#allocation4 + $0x188] ss:$16 sps:$4 sm:$0xff]  }
0x16a6   :  { %3287 = vmatpush2.bf16.msra.mxu0 %v4713_v21  ;;  %3247 = vmatprep.subr.bf16.mxu1 %v4718_v46  ;;  %v4791_v21 = vld [vmem:[#allocation4 + $0x388] ss:$16 sps:$4 sm:$0xff]   ;;  %v4796_v46 = vld [vmem:[#allocation4 + $0x16c] ss:$16 sps:$4 sm:$0xff]  }
0x16a7   :  { %3288 = vmatprep.subr.bf16.mxu0 %v4721_v59  ;;  %v4799_v59 = vld [vmem:[#allocation4 + $0x36c] ss:$16 sps:$4 sm:$0xff]  }
0x16a9   :  { %3248 = vmatpush2.bf16.msra.mxu1 %v4716_v40  ;;  %v4794_v40 = vld [vmem:[#allocation4 + $0x168] ss:$16 sps:$4 sm:$0xff]  }
0x16aa   :  { %3289 = vmatpush2.bf16.msra.mxu0 %v4719_v62  ;;  %3299 = vmatprep.subr.bf16.mxu1 %v4724_v45  ;;  %v4797_v62 = vld [vmem:[#allocation4 + $0x368] ss:$16 sps:$4 sm:$0xff]   ;;  %v4802_v45 = vld [vmem:[#allocation4 + $0x14c] ss:$16 sps:$4 sm:$0xff]  }
0x16ab   :  { %3340 = vmatprep.subr.bf16.mxu0 %v4727_v42  ;;  %v4805_v42 = vld [vmem:[#allocation4 + $0x34c] ss:$16 sps:$4 sm:$0xff]  }
0x16ac   :  { %3250 = vmatmul.mubr.bf16.vlgmr.msra.gmra.mxu1 %v5571_v61 }
0x16ad   :  { %3291 = vmatmul.mubr.bf16.vlgmr.msra.gmra.mxu0 %v5576_v24  ;;  %3300 = vmatpush1.bf16.msra.mxu1 %v4722_v25  ;;  %v4800_v25 = vld [vmem:[#allocation4 + $0x148] ss:$16 sps:$4 sm:$0xff]  }
0x16ae   :  { %3341 = vmatpush1.bf16.msra.mxu0 %v4725_v28  ;;  %3301 = vmatprep.subr.bf16.mxu1 %v4730_v34  ;;  %v4803_v28 = vld [vmem:[#allocation4 + $0x348] ss:$16 sps:$4 sm:$0xff]   ;;  %v4808_v34 = vld [vmem:[#allocation4 + $0x12c] ss:$16 sps:$4 sm:$0xff]  }
0x16af   :  { %3342 = vmatprep.subr.bf16.mxu0 %v4733_v16  ;;  %3331 = vmatprep.mubr.bf16.mxu1 %v5536_v4  ;;  %v4749_v4 = vld [vmem:[#allocation4 + $0x268] ss:$16 sps:$4 sm:$0xff]   ;;  %v4811_v16 = vld [vmem:[#allocation4 + $0x32c] ss:$16 sps:$4 sm:$0xff]  }
0x16b0   :  { %3372 = vmatprep.mubr.bf16.mxu0 %v5538_v5  ;;  %v4754_v5 = vld [vmem:[#allocation4 + $0x4c] ss:$16 sps:$4 sm:$0xff]  }
0x16b1   :  { %3302 = vmatpush1.bf16.msra.mxu1 %v4728_v29  ;;  %v4806_v29 = vld [vmem:[#allocation4 + $0x128] ss:$16 sps:$4 sm:$0xff]  }
0x16b2   :  { %3343 = vmatpush1.bf16.msra.mxu0 %v4731_v17  ;;  %3303 = vmatprep.subr.bf16.mxu1 %v4736_v39  ;;  %v4809_v17 = vld [vmem:[#allocation4 + $0x328] ss:$16 sps:$4 sm:$0xff]   ;;  %v4814_v39 = vld [vmem:[#allocation4 + $0x10c] ss:$16 sps:$4 sm:$0xff]  }
0x16b3   :  { %3344 = vmatprep.subr.bf16.mxu0 %v4739_v20  ;;  %v4817_v20 = vld [vmem:[#allocation4 + $0x30c] ss:$16 sps:$4 sm:$0xff]  }
0x16b5   :  { %3304 = vmatpush1.bf16.msra.mxu1 %v4734_v12  ;;  %v4812_v12 = vld [vmem:[#allocation4 + $0x108] ss:$16 sps:$4 sm:$0xff]  }
0x16b6   :  { %3345 = vmatpush1.bf16.msra.mxu0 %v4737_v13  ;;  %3305 = vmatprep.subr.bf16.mxu1 %v4742_v0  ;;  %v4815_v13 = vld [vmem:[#allocation4 + $0x308] ss:$16 sps:$4 sm:$0xff]   ;;  %v4820_v0 = vld [vmem:[#allocation4 + $0x4ec] ss:$16 sps:$4 sm:$0xff]  }
0x16b7   :  { %3346 = vmatprep.subr.bf16.mxu0 %v4745_v1  ;;  %v4823_v1 = vld [vmem:[#allocation4 + $0x6ec] ss:$16 sps:$4 sm:$0xff]  }
0x16b9   :  { %3306 = vmatpush1.bf16.msra.mxu1 %v4740_v26  ;;  %v4818_v26 = vld [vmem:[#allocation4 + $0x4e8] ss:$16 sps:$4 sm:$0xff]  }
0x16ba   :  { %3347 = vmatpush1.bf16.msra.mxu0 %v4743_v27  ;;  %3307 = vmatprep.subr.bf16.mxu1 %v4748_v30  ;;  %v4821_v27 = vld [vmem:[#allocation4 + $0x6e8] ss:$16 sps:$4 sm:$0xff]   ;;  %v4826_v30 = vld [vmem:[#allocation4 + $0x4cc] ss:$16 sps:$4 sm:$0xff]  }
0x16bb   :  { %3348 = vmatprep.subr.bf16.mxu0 %v4751_v18  ;;  %v4829_v18 = vld [vmem:[#allocation4 + $0x6cc] ss:$16 sps:$4 sm:$0xff]  }
0x16bd   :  { %3308 = vmatpush1.bf16.msra.mxu1 %v4746_v19  ;;  %v4824_v19 = vld [vmem:[#allocation4 + $0x4c8] ss:$16 sps:$4 sm:$0xff]  }
0x16be   :  { %3349 = vmatpush1.bf16.msra.mxu0 %v4749_v4  ;;  %3309 = vmatprep.subr.bf16.mxu1 %v4754_v5  ;;  %v4827_v4 = vld [vmem:[#allocation4 + $0x6c8] ss:$16 sps:$4 sm:$0xff]   ;;  %v4832_v5 = vld [vmem:[#allocation4 + $0x4ac] ss:$16 sps:$4 sm:$0xff]  }
0x16bf   :  { %3350 = vmatprep.subr.bf16.mxu0 %v4757_v22  ;;  %v4835_v22 = vld [vmem:[#allocation4 + $0x6ac] ss:$16 sps:$4 sm:$0xff]  }
0x16c1   :  { %3310 = vmatpush1.bf16.msra.mxu1 %v4752_v23  ;;  %v4830_v23 = vld [vmem:[#allocation4 + $0x4a8] ss:$16 sps:$4 sm:$0xff]  }
0x16c2   :  { %3351 = vmatpush1.bf16.msra.mxu0 %v4755_v31  ;;  %3311 = vmatprep.subr.bf16.mxu1 %v4760_v44  ;;  %v4833_v31 = vld [vmem:[#allocation4 + $0x6a8] ss:$16 sps:$4 sm:$0xff]  }
0x16c3   :  { %3352 = vmatprep.subr.bf16.mxu0 %v4763_v38  ;;  %v4836_v44 = vld [vmem:[#allocation4 + $0x488] ss:$16 sps:$4 sm:$0xff]  }
0x16c4   :  { %v4839_v38 = vld [vmem:[#allocation4 + $0x688] ss:$16 sps:$4 sm:$0xff]  }
0x16c5   :  { %3312 = vmatpush1.bf16.msra.mxu1 %v4758_v10  ;;  %v4844_v10 = vld [vmem:[#allocation4 + $0x46c] ss:$16 sps:$4 sm:$0xff]  }
0x16c6   :  { %3353 = vmatpush1.bf16.msra.mxu0 %v4761_v2  ;;  %3313 = vmatprep.subr.bf16.mxu1 %v4766_v7  ;;  %v4847_v2 = vld [vmem:[#allocation4 + $0x66c] ss:$16 sps:$4 sm:$0xff]  }
0x16c7   :  { %3354 = vmatprep.subr.bf16.mxu0 %v4769_v47  ;;  %v4850_v7 = vld [vmem:[#allocation4 + $0x44c] ss:$16 sps:$4 sm:$0xff]  }
0x16c8   :  { %v4853_v47 = vld [vmem:[#allocation4 + $0x64c] ss:$16 sps:$4 sm:$0xff]  }
0x16c9   :  { %3314 = vmatpush1.bf16.msra.mxu1 %v4764_v63  ;;  %v4848_v63 = vld [vmem:[#allocation4 + $0x448] ss:$16 sps:$4 sm:$0xff]  }
0x16ca   :  { %3355 = vmatpush1.bf16.msra.mxu0 %v4767_v41  ;;  %3315 = vmatprep.subr.bf16.mxu1 %v4772_v48  ;;  %v4851_v41 = vld [vmem:[#allocation4 + $0x648] ss:$16 sps:$4 sm:$0xff]   ;;  %v4856_v48 = vld [vmem:[#allocation4 + $0x42c] ss:$16 sps:$4 sm:$0xff]  }
0x16cb   :  { %3356 = vmatprep.subr.bf16.mxu0 %v4775_v50  ;;  %v4859_v50 = vld [vmem:[#allocation4 + $0x62c] ss:$16 sps:$4 sm:$0xff]  }
0x16cd   :  { %3316 = vmatpush2.bf16.msra.mxu1 %v4770_v51  ;;  %v4854_v51 = vld [vmem:[#allocation4 + $0x428] ss:$16 sps:$4 sm:$0xff]  }
0x16ce   :  { %3357 = vmatpush2.bf16.msra.mxu0 %v4773_v49  ;;  %3317 = vmatprep.subr.bf16.mxu1 %v4778_v36  ;;  %v4857_v49 = vld [vmem:[#allocation4 + $0x628] ss:$16 sps:$4 sm:$0xff]   ;;  %v4862_v36 = vld [vmem:[#allocation4 + $0x40c] ss:$16 sps:$4 sm:$0xff]  }
0x16cf   :  { %3358 = vmatprep.subr.bf16.mxu0 %v4781_v55  ;;  %v4865_v55 = vld [vmem:[#allocation4 + $0x60c] ss:$16 sps:$4 sm:$0xff]  }
0x16d1   :  { %3318 = vmatpush2.bf16.msra.mxu1 %v4776_v58  ;;  %v4860_v58 = vld [vmem:[#allocation4 + $0x408] ss:$16 sps:$4 sm:$0xff]  }
0x16d2   :  { %3359 = vmatpush2.bf16.msra.mxu0 %v4779_v56  ;;  %3319 = vmatprep.subr.bf16.mxu1 %v4784_v60  ;;  %v4863_v56 = vld [vmem:[#allocation4 + $0x608] ss:$16 sps:$4 sm:$0xff]   ;;  %v4868_v60 = vld [vmem:[#allocation4 + $0x5ec] ss:$16 sps:$4 sm:$0xff]  }
0x16d3   :  { %3360 = vmatprep.subr.bf16.mxu0 %v4787_v32  ;;  %v4871_v32 = vld [vmem:[#allocation4 + $0x7ec] ss:$16 sps:$4 sm:$0xff]  }
0x16d5   :  { %3320 = vmatpush2.bf16.msra.mxu1 %v4782_v53  ;;  %v4866_v53 = vld [vmem:[#allocation4 + $0x5e8] ss:$16 sps:$4 sm:$0xff]  }
0x16d6   :  { %3361 = vmatpush2.bf16.msra.mxu0 %v4785_v33  ;;  %3321 = vmatprep.subr.bf16.mxu1 %v4790_v37  ;;  %v4869_v33 = vld [vmem:[#allocation4 + $0x7e8] ss:$16 sps:$4 sm:$0xff]   ;;  %v4874_v37 = vld [vmem:[#allocation4 + $0x5cc] ss:$16 sps:$4 sm:$0xff]  }
0x16d7   :  { %3362 = vmatprep.subr.bf16.mxu0 %v4793_v8  ;;  %v4877_v8 = vld [vmem:[#allocation4 + $0x7cc] ss:$16 sps:$4 sm:$0xff]  }
0x16d9   :  { %3322 = vmatpush2.bf16.msra.mxu1 %v4788_v9  ;;  %v4872_v9 = vld [vmem:[#allocation4 + $0x5c8] ss:$16 sps:$4 sm:$0xff]  }
0x16da   :  { %3363 = vmatpush2.bf16.msra.mxu0 %v4791_v21  ;;  %3323 = vmatprep.subr.bf16.mxu1 %v4796_v46  ;;  %v4875_v21 = vld [vmem:[#allocation4 + $0x7c8] ss:$16 sps:$4 sm:$0xff]   ;;  %v4880_v46 = vld [vmem:[#allocation4 + $0x5ac] ss:$16 sps:$4 sm:$0xff]  }
0x16db   :  { %3364 = vmatprep.subr.bf16.mxu0 %v4799_v59  ;;  %v4883_v59 = vld [vmem:[#allocation4 + $0x7ac] ss:$16 sps:$4 sm:$0xff]  }
0x16dd   :  { %3324 = vmatpush2.bf16.msra.mxu1 %v4794_v40  ;;  %v4878_v40 = vld [vmem:[#allocation4 + $0x5a8] ss:$16 sps:$4 sm:$0xff]  }
0x16de   :  { %3365 = vmatpush2.bf16.msra.mxu0 %v4797_v62  ;;  %3325 = vmatprep.subr.bf16.mxu1 %v4802_v45  ;;  %v4881_v62 = vld [vmem:[#allocation4 + $0x7a8] ss:$16 sps:$4 sm:$0xff]   ;;  %v4886_v45 = vld [vmem:[#allocation4 + $0x58c] ss:$16 sps:$4 sm:$0xff]  }
0x16df   :  { %3366 = vmatprep.subr.bf16.mxu0 %v4805_v42  ;;  %v4889_v42 = vld [vmem:[#allocation4 + $0x78c] ss:$16 sps:$4 sm:$0xff]  }
0x16e1   :  { %3326 = vmatpush2.bf16.msra.mxu1 %v4800_v25  ;;  %v4884_v25 = vld [vmem:[#allocation4 + $0x588] ss:$16 sps:$4 sm:$0xff]  }
0x16e2   :  { %3367 = vmatpush2.bf16.msra.mxu0 %v4803_v28  ;;  %3327 = vmatprep.subr.bf16.mxu1 %v4808_v34  ;;  %v4887_v28 = vld [vmem:[#allocation4 + $0x788] ss:$16 sps:$4 sm:$0xff]   ;;  %v4892_v34 = vld [vmem:[#allocation4 + $0x56c] ss:$16 sps:$4 sm:$0xff]  }
0x16e3   :  { %3368 = vmatprep.subr.bf16.mxu0 %v4811_v16  ;;  %v4895_v16 = vld [vmem:[#allocation4 + $0x76c] ss:$16 sps:$4 sm:$0xff]  }
0x16e5   :  { %3328 = vmatpush2.bf16.msra.mxu1 %v4806_v29  ;;  %v4890_v29 = vld [vmem:[#allocation4 + $0x568] ss:$16 sps:$4 sm:$0xff]  }
0x16e6   :  { %3369 = vmatpush2.bf16.msra.mxu0 %v4809_v17  ;;  %3329 = vmatprep.subr.bf16.mxu1 %v4814_v39  ;;  %v4893_v17 = vld [vmem:[#allocation4 + $0x768] ss:$16 sps:$4 sm:$0xff]   ;;  %v4898_v39 = vld [vmem:[#allocation4 + $0x54c] ss:$16 sps:$4 sm:$0xff]  }
0x16e7   :  { %3370 = vmatprep.subr.bf16.mxu0 %v4817_v20  ;;  %v4901_v20 = vld [vmem:[#allocation4 + $0x74c] ss:$16 sps:$4 sm:$0xff]  }
0x16e9   :  { %3330 = vmatpush2.bf16.msra.mxu1 %v4812_v12  ;;  %v4896_v12 = vld [vmem:[#allocation4 + $0x548] ss:$16 sps:$4 sm:$0xff]  }
0x16ea   :  { %3371 = vmatpush2.bf16.msra.mxu0 %v4815_v13  ;;  %3381 = vmatprep.subr.bf16.mxu1 %v4820_v0  ;;  %v4899_v13 = vld [vmem:[#allocation4 + $0x748] ss:$16 sps:$4 sm:$0xff]   ;;  %v4904_v0 = vld [vmem:[#allocation4 + $0x52c] ss:$16 sps:$4 sm:$0xff]  }
0x16eb   :  { %3422 = vmatprep.subr.bf16.mxu0 %v4823_v1  ;;  %v4907_v1 = vld [vmem:[#allocation4 + $0x72c] ss:$16 sps:$4 sm:$0xff]  }
0x16ec   :  { %3332 = vmatmul.mubr.bf16.vlgmr.msra.gmra.mxu1 %v5547_v52  ;;  %v4838_v52 = vld [vmem:[#allocation4 + $0x48c] ss:$16 sps:$4 sm:$0xff]  }
0x16ed   :  { %3373 = vmatmul.mubr.bf16.vlgmr.msra.gmra.mxu0 %v5552_v43  ;;  %3382 = vmatpush1.bf16.msra.mxu1 %v4818_v26  ;;  %v4841_v43 = vld [vmem:[#allocation4 + $0x68c] ss:$16 sps:$4 sm:$0xff]   ;;  %v4902_v26 = vld [vmem:[#allocation4 + $0x528] ss:$16 sps:$4 sm:$0xff]  }
0x16ee   :  { %3423 = vmatpush1.bf16.msra.mxu0 %v4821_v27  ;;  %3383 = vmatprep.subr.bf16.mxu1 %v4826_v30  ;;  %v4905_v27 = vld [vmem:[#allocation4 + $0x728] ss:$16 sps:$4 sm:$0xff]   ;;  %v4910_v30 = vld [vmem:[#allocation4 + $0x50c] ss:$16 sps:$4 sm:$0xff]  }
0x16ef   :  { %3424 = vmatprep.subr.bf16.mxu0 %v4829_v18  ;;  %3413 = vmatprep.mubr.bf16.mxu1 %v5557_v54  ;;  %v4842_v54 = vld [vmem:[#allocation4 + $0x468] ss:$16 sps:$4 sm:$0xff]   ;;  %v4913_v18 = vld [vmem:[#allocation4 + $0x70c] ss:$16 sps:$4 sm:$0xff]  }
0x16f0   :  { %3454 = vmatprep.mubr.bf16.mxu0 %v5562_v57  ;;  %v4845_v57 = vld [vmem:[#allocation4 + $0x668] ss:$16 sps:$4 sm:$0xff]  }
0x16f1   :  { %3384 = vmatpush1.bf16.msra.mxu1 %v4824_v19  ;;  %v4908_v19 = vld [vmem:[#allocation4 + $0x508] ss:$16 sps:$4 sm:$0xff]  }
0x16f2   :  { %3425 = vmatpush1.bf16.msra.mxu0 %v4827_v4  ;;  %3385 = vmatprep.subr.bf16.mxu1 %v4832_v5  ;;  %v4911_v4 = vld [vmem:[#allocation4 + $0x708] ss:$16 sps:$4 sm:$0xff]  }
0x16f3   :  { %3426 = vmatprep.subr.bf16.mxu0 %v4835_v22  ;;  %v3498_v5 = vld [vmem:[%s5863_s10 + $0xf8] sm:$0xff] }
0x16f4   :  { %v3482_v22 = vld [vmem:[%s5863_s10 + $0x78] sm:$0xff] }
0x16f5   :  { %3386 = vmatpush1.bf16.msra.mxu1 %v4830_v23  ;;  %v3497_v23 = vld [vmem:[%s5863_s10 + $0xf0] sm:$0xff] }
0x16f6   :  { %3427 = vmatpush1.bf16.msra.mxu0 %v4833_v31  ;;  %3387 = vmatprep.subr.bf16.mxu1 %v4838_v52 }
0x16f7   :  { %3428 = vmatprep.subr.bf16.mxu0 %v4841_v43  ;;  %v3481_v43 = vld [vmem:[%s5863_s10 + $0x70] sm:$0xff] }
0x16f9   :  { %3388 = vmatpush1.bf16.msra.mxu1 %v4836_v44  ;;  %v3496_v44 = vld [vmem:[%s5863_s10 + $0xe8] sm:$0xff] }
0x16fa   :  { %3429 = vmatpush1.bf16.msra.mxu0 %v4839_v38  ;;  %3389 = vmatprep.subr.bf16.mxu1 %v4844_v10 }
0x16fb   :  { %3430 = vmatprep.subr.bf16.mxu0 %v4847_v2 }
0x16fd   :  { %3390 = vmatpush1.bf16.msra.mxu1 %v4842_v54 }
0x16fe   :  { %3431 = vmatpush1.bf16.msra.mxu0 %v4845_v57  ;;  %3391 = vmatprep.subr.bf16.mxu1 %v4850_v7  ;;  %v3479_v57 = vld [vmem:[%s5863_s10 + $0x60] sm:$0xff]  ;;  %v3494_v7 = vld [vmem:[%s5863_s10 + $0xd8] sm:$0xff] }
0x16ff   :  { %3432 = vmatprep.subr.bf16.mxu0 %v4853_v47  ;;  %v3478_v47 = vld [vmem:[%s5863_s10 + $0x58] sm:$0xff] }
0x1701   :  { %3392 = vmatpush1.bf16.msra.mxu1 %v4848_v63 }
0x1702   :  { %3433 = vmatpush1.bf16.msra.mxu0 %v4851_v41  ;;  %3393 = vmatprep.subr.bf16.mxu1 %v4856_v48  ;;  %v3530_v48 = vld [vmem:[%s5863_s10 + $0x1f8] sm:$0xff] }
0x1703   :  { %3434 = vmatprep.subr.bf16.mxu0 %v4859_v50  ;;  %v3514_v50 = vld [vmem:[%s5863_s10 + $0x178] sm:$0xff] }
0x1705   :  { %3394 = vmatpush1.bf16.msra.mxu1 %v4854_v51  ;;  %v3529_v51 = vld [vmem:[%s5863_s10 + $0x1f0] sm:$0xff] }
0x1706   :  { %3435 = vmatpush1.bf16.msra.mxu0 %v4857_v49  ;;  %3395 = vmatprep.subr.bf16.mxu1 %v4862_v36  ;;  %v3493_v49 = vld [vmem:[%s5863_s10 + $0xd0] sm:$0xff] }
0x1707   :  { %3436 = vmatprep.subr.bf16.mxu0 %v4865_v55  ;;  %v3513_v36 = vld [vmem:[%s5863_s10 + $0x170] sm:$0xff] }
0x1708   :  { %v3477_v55 = vld [vmem:[%s5863_s10 + $0x50] sm:$0xff] }
0x1709   :  { %3396 = vmatpush1.bf16.msra.mxu1 %v4860_v58  ;;  %v3528_v58 = vld [vmem:[%s5863_s10 + $0x1e8] sm:$0xff] }
0x170a   :  { %3437 = vmatpush1.bf16.msra.mxu0 %v4863_v56  ;;  %3397 = vmatprep.subr.bf16.mxu1 %v4868_v60  ;;  %v3492_v56 = vld [vmem:[%s5863_s10 + $0xc8] sm:$0xff] }
0x170b   :  { %3438 = vmatprep.subr.bf16.mxu0 %v4871_v32  ;;  %v3512_v60 = vld [vmem:[%s5863_s10 + $0x168] sm:$0xff] }
0x170c   :  { %v3476_v32 = vld [vmem:[%s5863_s10 + $0x48] sm:$0xff] }
0x170d   :  { %3398 = vmatpush2.bf16.msra.mxu1 %v4866_v53  ;;  %v3527_v53 = vld [vmem:[%s5863_s10 + $0x1e0] sm:$0xff] }
0x170e   :  { %3439 = vmatpush2.bf16.msra.mxu0 %v4869_v33  ;;  %3399 = vmatprep.subr.bf16.mxu1 %v4874_v37  ;;  %v3491_v33 = vld [vmem:[%s5863_s10 + $0xc0] sm:$0xff] }
0x170f   :  { %3440 = vmatprep.subr.bf16.mxu0 %v4877_v8  ;;  %v3511_v37 = vld [vmem:[%s5863_s10 + $0x160] sm:$0xff] }
0x1710   :  { %v3475_v8 = vld [vmem:[%s5863_s10 + $0x40] sm:$0xff] }
0x1711   :  { %3400 = vmatpush2.bf16.msra.mxu1 %v4872_v9  ;;  %v3526_v9 = vld [vmem:[%s5863_s10 + $0x1d8] sm:$0xff] }
0x1712   :  { %3441 = vmatpush2.bf16.msra.mxu0 %v4875_v21  ;;  %3401 = vmatprep.subr.bf16.mxu1 %v4880_v46  ;;  %v3490_v21 = vld [vmem:[%s5863_s10 + $0xb8] sm:$0xff] }
0x1713   :  { %3442 = vmatprep.subr.bf16.mxu0 %v4883_v59  ;;  %v3510_v46 = vld [vmem:[%s5863_s10 + $0x158] sm:$0xff] }
0x1714   :  { %v3474_v59 = vld [vmem:[%s5863_s10 + $0x38] sm:$0xff] }
0x1715   :  { %3402 = vmatpush2.bf16.msra.mxu1 %v4878_v40  ;;  %v3525_v40 = vld [vmem:[%s5863_s10 + $0x1d0] sm:$0xff] }
0x1716   :  { %3443 = vmatpush2.bf16.msra.mxu0 %v4881_v62  ;;  %3403 = vmatprep.subr.bf16.mxu1 %v4886_v45  ;;  %v3489_v62 = vld [vmem:[%s5863_s10 + $0xb0] sm:$0xff] }
0x1717   :  { %3444 = vmatprep.subr.bf16.mxu0 %v4889_v42  ;;  %v3509_v45 = vld [vmem:[%s5863_s10 + $0x150] sm:$0xff] }
0x1718   :  { %v3473_v42 = vld [vmem:[%s5863_s10 + $0x30] sm:$0xff] }
0x1719   :  { %3404 = vmatpush2.bf16.msra.mxu1 %v4884_v25  ;;  %v3524_v25 = vld [vmem:[%s5863_s10 + $0x1c8] sm:$0xff] }
0x171a   :  { %3445 = vmatpush2.bf16.msra.mxu0 %v4887_v28  ;;  %3405 = vmatprep.subr.bf16.mxu1 %v4892_v34  ;;  %v3488_v28 = vld [vmem:[%s5863_s10 + $0xa8] sm:$0xff] }
0x171b   :  { %3446 = vmatprep.subr.bf16.mxu0 %v4895_v16  ;;  %v3508_v34 = vld [vmem:[%s5863_s10 + $0x148] sm:$0xff] }
0x171c   :  { %v3472_v16 = vld [vmem:[%s5863_s10 + $0x28] sm:$0xff] }
0x171d   :  { %3406 = vmatpush2.bf16.msra.mxu1 %v4890_v29  ;;  %v3523_v29 = vld [vmem:[%s5863_s10 + $0x1c0] sm:$0xff] }
0x171e   :  { %3447 = vmatpush2.bf16.msra.mxu0 %v4893_v17  ;;  %3407 = vmatprep.subr.bf16.mxu1 %v4898_v39  ;;  %v3487_v17 = vld [vmem:[%s5863_s10 + $0xa0] sm:$0xff] }
0x171f   :  { %3448 = vmatprep.subr.bf16.mxu0 %v4901_v20  ;;  %v3507_v39 = vld [vmem:[%s5863_s10 + $0x140] sm:$0xff] }
0x1720   :  { %v3471_v20 = vld [vmem:[%s5863_s10 + $0x20] sm:$0xff] }
0x1721   :  { %3408 = vmatpush2.bf16.msra.mxu1 %v4896_v12  ;;  %v3522_v12 = vld [vmem:[%s5863_s10 + $0x1b8] sm:$0xff] }
0x1722   :  { %3449 = vmatpush2.bf16.msra.mxu0 %v4899_v13  ;;  %3409 = vmatprep.subr.bf16.mxu1 %v4904_v0  ;;  %v3486_v13 = vld [vmem:[%s5863_s10 + $0x98] sm:$0xff] }
0x1723   :  { %3450 = vmatprep.subr.bf16.mxu0 %v4907_v1  ;;  %v3506_v0 = vld [vmem:[%s5863_s10 + $0x138] sm:$0xff] }
0x1724   :  { %v3470_v1 = vld [vmem:[%s5863_s10 + $0x18] sm:$0xff] }
0x1725   :  { %3410 = vmatpush2.bf16.msra.mxu1 %v4902_v26  ;;  %v3521_v26 = vld [vmem:[%s5863_s10 + $0x1b0] sm:$0xff] }
0x1726   :  { %3451 = vmatpush2.bf16.msra.mxu0 %v4905_v27  ;;  %3411 = vmatprep.subr.bf16.mxu1 %v4910_v30  ;;  %v3485_v27 = vld [vmem:[%s5863_s10 + $0x90] sm:$0xff] }
0x1727   :  { %3452 = vmatprep.subr.bf16.mxu0 %v4913_v18  ;;  %v3505_v30 = vld [vmem:[%s5863_s10 + $0x130] sm:$0xff] }
0x1728   :  { %v3469_v18 = vld [vmem:[%s5863_s10 + $0x10] sm:$0xff] }
0x1729   :  { %3412 = vmatpush2.bf16.msra.mxu1 %v4908_v19  ;;  %v3520_v19 = vld [vmem:[%s5863_s10 + $0x1a8] sm:$0xff] }
0x172a   :  { %3453 = vmatpush2.bf16.msra.mxu0 %v4911_v4  ;;  %4261 = vmatprep.subr.mxu1 %v3498_v5  ;;  %v3484_v4 = vld [vmem:[%s5863_s10 + $0x88] sm:$0xff] }
0x172b   :  { %4296 = vmatprep.subr.mxu0 %v3530_v48  ;;  %v3504_v5 = vld [vmem:[%s5863_s10 + $0x128] sm:$0xff]  ;;  %v3502_v48 = vld [vmem:[%s5863_s10 + $0x118] sm:$0xff] }
0x172c   :  { %v5595_v31 = vpop.f32.mrf.mxu1  ;;  %3414 = vmatmul.mubr.bf16.vlgmr.msra.gmra.mxu1 %v5571_v61  ;;  %v3480_v61 = vld [vmem:[%s5863_s10 + $0x68] sm:$0xff] }
0x172d   :  { %v5597_v52 = vpop.f32.mrf.mxu0  ;;  %3455 = vmatmul.mubr.bf16.vlgmr.msra.gmra.mxu0 %v5576_v24  ;;  %4262 = vmatpush3.msra.mxu1 %v3482_v22  ;;  %v3495_v24 = vld [vmem:[%s5863_s10 + $0xe0] sm:$0xff]  ;;  %v3468_v22 = vld [vmem:[%s5863_s10 + $0x8] sm:$0xff] }
0x172e   :  { %v5607_v38 = vpop.f32.mrf.mxu1  ;;  %4263 = vmatprep.subr.mxu1 %v3497_v23  ;;  %4297 = vmatpush3.msra.mxu0 %v3514_v50  ;;  %v3483_v23 = vld [vmem:[%s5863_s10 + $0x80] sm:$0xff] }
0x172f   :  { %v5609_v10 = vpop.f32.mrf.mxu0  ;;  %4264 = vmatpush3.msra.mxu1 %v3481_v43  ;;  %4298 = vmatprep.subr.mxu0 %v3529_v51  ;;  %v3467_v43 = vld [vmem:[%s5863_s10] sm:$0xff]  ;;  %v3517_v51 = vld [vmem:[%s5863_s10 + $0x190] sm:$0xff] }
0x1730   :  { %v3173_v2 = vpop.f32.mrf.mxu1  ;;  %4265 = vmatprep.subr.mxu1 %v3496_v44  ;;  %4299 = vmatpush3.msra.mxu0 %v3513_v36  ;;  %v5762_v44 = vld [vmem:[%s5862_s9] sm:$0xf] }
0x1731   :  { %v3214_v54 = vpop.f32.mrf.mxu0  ;;  %4266 = vmatpush3.msra.mxu1 %v3480_v61  ;;  %4300 = vmatprep.subr.mxu0 %v3528_v58  ;;  %v1838_v61 = vrot.slane %v5762_v44, %v1191_v14  ;;  %v3503_v14 = vld [vmem:[%s5863_s10 + $0x120] sm:$0xff] }
0x1732   :  { %v3174_v63 = vpop.f32.mrf.mxu1  ;;  %4267 = vmatprep.subr.mxu1 %v3495_v24  ;;  %4301 = vmatpush3.msra.mxu0 %v3512_v60  ;;  %v1842_v24 = vrot.slane %v5762_v44, %v1195_v3 }
0x1733   :  { %v3215_v41 = vpop.f32.mrf.mxu0  ;;  %4268 = vmatpush3.msra.mxu1 %v3479_v57  ;;  %4302 = vmatprep.subr.mxu0 %v3527_v53  ;;  %v3170_v2 = vadd.f32 %v5595_v31, %v1838_v61  ;;  %v3518_v31 = vld [vmem:[%s5863_s10 + $0x198] sm:$0xff]  ;;  %v3500_v53 = vld [vmem:[%s5863_s10 + $0x108] sm:$0xff] }
0x1734   :  { %4269 = vmatprep.subr.mxu1 %v3494_v7  ;;  %4303 = vmatpush3.msra.mxu0 %v3511_v37  ;;  %v3172_v54 = vadd.f32 %v5607_v38, %v1842_v24  ;;  %v3519_v7 = vld [vmem:[%s5863_s10 + $0x1a0] sm:$0xff] }
0x1735   :  { %4270 = vmatpush3.msra.mxu1 %v3478_v47  ;;  %4304 = vmatprep.subr.mxu0 %v3526_v9  ;;  %v3211_v57 = vadd.f32 %v5597_v52, %v3170_v2  ;;  %v3515_v37 = vld [vmem:[%s5863_s10 + $0x180] sm:$0xff] }
0x1736   :  { %4271 = vmatprep.subr.mxu1 %v3493_v49  ;;  %4305 = vmatpush3.msra.mxu0 %v3510_v46  ;;  %v3213_v41 = vadd.f32 %v5609_v10, %v3172_v54 }
0x1737   :  { %4272 = vmatpush3.msra.mxu1 %v3477_v55  ;;  %4306 = vmatprep.subr.mxu0 %v3525_v40  ;;  %v3501_v55 = vld [vmem:[%s5863_s10 + $0x110] sm:$0xff] }
0x1738   :  { %4273 = vmatprep.subr.mxu1 %v3492_v56  ;;  %4307 = vmatpush3.msra.mxu0 %v3509_v45  ;;  %v3516_v56 = vld [vmem:[%s5863_s10 + $0x188] sm:$0xff] }
0x1739   :  { %4274 = vmatpush3.msra.mxu1 %v3476_v32  ;;  %4308 = vmatprep.subr.mxu0 %v3524_v25 }
0x173a   :  { %4275 = vmatprep.subr.mxu1 %v3491_v33  ;;  %4309 = vmatpush3.msra.mxu0 %v3508_v34  ;;  %v3693_v34 = vld [vmem:[%s5865_s12 + $0x10] sm:$0xff] }
0x173b   :  { %4276 = vmatpush3.msra.mxu1 %v3475_v8  ;;  %4310 = vmatprep.subr.mxu0 %v3523_v29  ;;  %v3499_v8 = vld [vmem:[%s5863_s10 + $0x100] sm:$0xff] }
0x173c   :  { %4277 = vmatprep.subr.mxu1 %v3490_v21  ;;  %4311 = vmatpush3.msra.mxu0 %v3507_v39  ;;  %v3691_v29 = vld [vmem:[%s5865_s12] sm:$0xff]  ;;  %v1846_v39 = vrot.slane %v5762_v44, %v1199_v15 }
0x173d   :  { %4278 = vmatpush3.msra.mxu1 %v3474_v59  ;;  %4312 = vmatprep.subr.mxu0 %v3522_v12 }
0x173e   :  { %4279 = vmatprep.subr.mxu1 %v3489_v62  ;;  %4313 = vmatpush3.msra.mxu0 %v3506_v0 }
0x173f   :  { %4280 = vmatpush3.msra.mxu1 %v3473_v42  ;;  %4314 = vmatprep.subr.mxu0 %v3521_v26 }
0x1740   :  { %4281 = vmatprep.subr.mxu1 %v3488_v28  ;;  %4315 = vmatpush3.msra.mxu0 %v3505_v30  ;;  %v3694_v28 = vld [vmem:[%s5865_s12 + $0x18] sm:$0xff] }
0x1741   :  { %4282 = vmatpush3.msra.mxu1 %v3472_v16  ;;  %4316 = vmatprep.subr.mxu0 %v3520_v19  ;;  %v3692_v16 = vld [vmem:[%s5865_s12 + $0x8] sm:$0xff] }
0x1742   :  { %4283 = vmatprep.subr.mxu1 %v3487_v17  ;;  %4317 = vmatpush3.msra.mxu0 %v3504_v5  ;;  %v3704_v17 = vpop.permute.xlu0 %3703 }
0x1743   :  { %4284 = vmatpush3.msra.mxu1 %v3471_v20  ;;  %4318 = vmatprep.subr.mxu0 %v3519_v7  ;;  %v1850_v20 = vrot.slane %v5762_v44, %v1203_v6  ;;  %v3778_v7 = vld [vmem:[%s5867_s14] sm:$0xff] }
0x1744   :  { %4285 = vmatprep.subr.mxu1 %v3486_v13  ;;  %4319 = vmatpush3.msra.mxu0 %v3503_v14 }
0x1745   :  { %4286 = vmatpush3.msra.mxu1 %v3470_v1  ;;  %4320 = vmatprep.subr.mxu0 %v3518_v31 }
0x1746   :  { %4287 = vmatprep.subr.mxu1 %v3485_v27  ;;  %4321 = vmatpush3.msra.mxu0 %v3502_v48 }
0x1747   :  { %4288 = vmatpush3.msra.mxu1 %v3469_v18  ;;  %4322 = vmatprep.subr.mxu0 %v3517_v51 }
0x1748   :  { %4289 = vmatprep.subr.mxu1 %v3484_v4  ;;  %4323 = vmatpush3.msra.mxu0 %v3501_v55 }
0x1749   :  { %4290 = vmatpush3.msra.mxu1 %v3468_v22  ;;  %4324 = vmatprep.subr.mxu0 %v3516_v56 }
0x174a   :  { %4291 = vmatprep.subr.mxu1 %v3483_v23  ;;  %4325 = vmatpush3.msra.mxu0 %v3500_v53 }
0x174b   :  { %4292 = vmatpush3.msra.mxu1 %v3467_v43  ;;  %4326 = vmatprep.subr.mxu0 %v3515_v37 }
0x174c   :  { %4438 = vmatprep.subr.mxu1 %v4960_v35  ;;  %4327 = vmatpush3.msra.mxu0 %v3499_v8 }
0x174d   :  { %4449 = vmatprep.subr.mxu0 %v4960_v35 }
0x176c   :  { %v3251_v47 = vpop.f32.mrf.mxu1 }
0x176d   :  { %v3292_v63 = vpop.f32.mrf.mxu0  ;;  %v3252_v3 = vadd.f32 %v3251_v47, %v3211_v57  ;;  %v3779_v57 = vld [vmem:[%s5867_s14 + $0x8] sm:$0xff] }
0x176e   :  { %v3253_v52 = vpop.f32.mrf.mxu1 }
0x176f   :  { %v3294_v38 = vpop.f32.mrf.mxu0  ;;  %v3254_v50 = vadd.f32 %v3253_v52, %v3213_v41  ;;  %v3293_v10 = vadd.f32 %v3292_v63, %v3252_v3  ;;  %v4207_v63 = vld [vmem:[%s5864_s11] ss:$0 sm:$0xff] }
0x1770   :  { %v3255_v49 = vpop.f32.mrf.mxu1 }
0x1771   :  { %v3296_v36 = vpop.f32.mrf.mxu0  ;;  %v3295_v58 = vadd.f32 %v3294_v38, %v3254_v50  ;;  %v3463_v9 = vmax.f32 %v3293_v10, 0.0  ;;  %v4208_v38 = vld [vmem:[%s5869_s16] ss:$0 sm:$0xff] }
0x1772   :  { %v3256_v60 = vpop.f32.mrf.mxu1  ;;  %v4211_v36 = vld [vmem:[%s5868_s15] ss:$0 sm:$0xff] }
0x1773   :  { %v3297_v32 = vpop.f32.mrf.mxu0  ;;  %v3464_v33 = vmax.f32 %v3295_v58, 0.0 }
0x1775   :  { %3602 = vmatprep.mubr.f32.mxu1 %v3464_v33 }
0x1776   :  { %3603 = vmatmul.mubr.f32.vlgmr.msra.gmra.mxu1 %v3463_v9 }
0x1777   :  { %4446 = vmatprep.mubr.msk.f32.mxu1 %vm4961_vm1, %v4960_v35  ;;  %4439 = vmatpush3.msra.mxu1 %v3694_v28 }
0x1778   :  { %4440 = vmatprep.subr.mxu1 %v4960_v35 }
0x1779   :  { %4441 = vmatpush3.msra.mxu1 %v3693_v34 }
0x177a   :  { %4442 = vmatprep.subr.mxu1 %v4960_v35 }
0x177b   :  { %4443 = vmatpush3.msra.mxu1 %v3692_v16 }
0x177c   :  { %4444 = vmatprep.subr.mxu1 %v4960_v35 }
0x177d   :  { %4445 = vmatpush3.msra.mxu1 %v3691_v29 }
0x177e   :  { %4447 = vmatmul.mubr.msk.f32.vlgmr.msra.gmra.mxu1 %vm184_vm0, %v3704_v17  ;;  %vm3787_vm0 = vcmask 130048  }
0x17ac   :  { %v3333_v21 = vpop.f32.mrf.mxu1 }
0x17ad   :  { %v3374_v46 = vpop.f32.mrf.mxu0  ;;  %v3334_v12 = vadd.f32 %v3333_v21, %v1846_v39 }
0x17ae   :  { %v3335_v59 = vpop.f32.mrf.mxu1 }
0x17af   :  { %v3376_v40 = vpop.f32.mrf.mxu0  ;;  %v3336_v13 = vadd.f32 %v3335_v59, %v1850_v20  ;;  %v3375_v0 = vadd.f32 %v3374_v46, %v3334_v12 }
0x17b0   :  { %v3337_v62 = vpop.f32.mrf.mxu1 }
0x17b1   :  { %v3378_v45 = vpop.f32.mrf.mxu0  ;;  %v3377_v27 = vadd.f32 %v3376_v40, %v3336_v13 }
0x17b2   :  { %v3338_v42 = vpop.f32.mrf.mxu1 }
0x17b3   :  { %v3379_v25 = vpop.f32.mrf.mxu0 }
0x17ec   :  { %v3415_v1 = vpop.f32.mrf.mxu1 }
0x17ed   :  { %v3456_v26 = vpop.f32.mrf.mxu0  ;;  %v3416_v30 = vadd.f32 %v3415_v1, %v3375_v0 }
0x17ee   :  { %v3417_v18 = vpop.f32.mrf.mxu1 }
0x17ef   :  { %v3458_v19 = vpop.f32.mrf.mxu0  ;;  %v3418_v4 = vadd.f32 %v3417_v18, %v3377_v27  ;;  %v3457_v5 = vadd.f32 %v3456_v26, %v3416_v30 }
0x17f0   :  { %v3419_v22 = vpop.f32.mrf.mxu1 }
0x17f1   :  { %v3460_v23 = vpop.f32.mrf.mxu0  ;;  %v3459_v43 = vadd.f32 %v3458_v19, %v3418_v4  ;;  %v3465_v11 = vmax.f32 %v3457_v5, 0.0 }
0x17f2   :  { %v3420_v61 = vpop.f32.mrf.mxu1 }
0x17f3   :  { %v3461_v15 = vpop.f32.mrf.mxu0  ;;  %v3466_v24 = vmax.f32 %v3459_v43, 0.0 }
0x17f5   :  { %3672 = vmatprep.mubr.f32.mxu0 %v3466_v24 }
0x17f6   :  { %3673 = vmatmul.mubr.f32.vlgmr.msra.gmra.mxu0 %v3465_v11 }
0x17f7   :  { %4453 = vmatprep.mubr.msk.f32.mxu0 %vm4961_vm1, %v4960_v35  ;;  %4450 = vmatpush3.msra.mxu0 %v3779_v57 }
0x17f8   :  { %4451 = vmatprep.subr.mxu0 %v4960_v35  ;;  %v4209_v35 = vld [vmem:[%s5866_s13] ss:$0 sm:$0xff]  ;;  %s4934_s13 = scalar_lea.vmem %s3869_s22, 32 }
0x17f9   :  { %4452 = vmatpush3.msra.mxu0 %v3778_v7  ;;  %p4935_p5 = scmp.ne.s32.totalorder %s3869_s22, %s4934_s13  ;;  %p4940_p7 = scmp.lt.s32.totalorder %s4934_s13, %s4934_s13 }
0x17fb   :  { %p4941_p8 = por %p4940_p7, %p4939_p6 }
0x17fd   :  { %p4942_p9 = pnand %p4941_p8, %p4935_p5 }
0x1836   :  { %v4293_v6 = vpop.f32.mrf.mxu1 }
0x1838   :  { %v4294_v44 = vpop.f32.mrf.mxu1 }
0x1839   :  { %v4295_v47 = vadd.f32 %v4294_v44, %v4293_v6 }
0x183b   :  { %v3605_v3 = vadd.f32 %v4295_v47, %v4207_v63 }
0x183e   :  { %v3773_v2 = vpop.f32.mrf.mxu1 }
0x183f   :  { %v3774_v50 = vadd.f32 %v4209_v35, %v3773_v2 }
0x1840   :  { %v4448_v54 = vpop.f32.mrf.mxu1 }
0x18b6   :  { %v4328_v14 = vpop.f32.mrf.mxu0 }
0x18b8   :  { %v4329_v41 = vpop.f32.mrf.mxu0 }
0x18b9   :  { %v4330_v31 = vadd.f32 %v4329_v41, %v4328_v14 }
0x18bb   :  { %v3675_v52 = vadd.f32 %v4330_v31, %v3605_v3 }
0x18bd   :  { %3686 = vrot.lane.b32.xlu0 %v3675_v52, %s4966_s19 }
0x192f   :  { %v3687_v48 = vpop.permute.xlu0 %3686 }
0x1930   :  { %v3689_v51 = vmul.f32 %v4208_v38, %v3687_v48 }
0x1932   :  { %v3690_v10 = vadd.f32 %v3689_v51, %v3675_v52 }
0x1934   :  { %v3777_v49 = vadd.f32 %v3774_v50, %v3690_v10 }
0x1936   :  { %4454 = vmatmul.mubr.msk.f32.vlgmr.msra.gmra.mxu0 %vm3787_vm0, %v3777_v49 }
0x19f6   :  { %v3857_v55 = vpop.f32.mrf.mxu0 }
0x19f7   :  { %v3858_v58 = vadd.f32 %v4211_v36, %v3857_v55 }
0x19f8   :  { %v4455_v56 = vpop.f32.mrf.mxu0 }
0x19f9   :  { %3861 = vst [vmem:[#allocation6] sm:$0x3] %v3858_v58 }
0x19fa   :  { %4945 = shalt.err (!%p4942_p9)
}
0x19fb   :  { %3871 = dma.vmem_to_hbm [thread:$0]  %s3869_s22, 32, %s5870_s17, [#allocation7]  }
0x19fc   :  { %4958 = dma.done.wait [#allocation7], 32  }
0x19fd   :  { %4959 = vsyncadd [#allocation7], 4294967264 }
0x19fe   :  { %3875 = vsyncpa [#allocation7], 1 }
0x19ff   :  { %3876 = vsyncmov [#allocation5] }
0x1a02   :  { %s3877_s15 = vpop.sfrf %3876 }
0x1a03   :  { %p4213_p10 = scmp.ne.s32.totalorder %s3877_s15, 0 }
0x1a05   :  { %3881 = shalt.err (%p4213_p10)  }
0x1a06   :  { %3883 = vsyncmov [#allocation5 + $0x1] }
0x1a09   :  { %s3884_s24 = vpop.sfrf %3883 }
0x1a0a   :  { %p4214_p11 = scmp.ne.s32.totalorder %s3884_s24, 0 }
0x1a0c   :  { %3888 = shalt.err (%p4214_p11)  }

</bundles_post_ra>
